<compile_context>
chip_gen: v7x
topology: tpu7x:2x2x1
jax: 0.10.0
libtpu: 0.0.40
codegen_flags: <defaults>
</compile_context>

<pallas_src>
import jax
import jax.numpy as jnp
from jax.experimental import pallas as pl
from jax.experimental.pallas import tpu as pltpu

LANE = 128


def _round_up(n, m):
    return ((n + m - 1) // m) * m


def _choose_block_b(batch):
    """Large batch tiles for MXU / pipeline efficiency, but keep >= 2 grid
    steps when possible so both of v7x's TensorCores get work."""
    if batch <= 8:
        return 8
    half = _round_up(batch, 8) // 2          # aim for at least 2 grid steps
    return max(8, min(512, _round_up(half, 8)))


# -----------------------------------------------------------------------------
# Kernel: whole MLP body for one batch tile.
# slab rows: 0 = bn_scale, 1 = bn_shift, 2 = b1, 3 = b2, 4 = b3 (P lanes each).
# -----------------------------------------------------------------------------
def critic_kernel(in_ref, slab_ref, w1_ref, w2h_ref, w2a_ref, w3_ref, out_ref):
    x = in_ref[...]                                   # (TB, P): state | actions | 0

    # BatchNorm folded into per-feature scale/shift (zero on non-state lanes;
    # w1 rows for those lanes are zero so they never contribute).
    xn = x * slab_ref[0:1, :] + slab_ref[1:2, :]

    def elu(v):
        # exp(min(v,0)) - 1; expm1 has no guaranteed Mosaic lowering and the
        # absolute difference near zero is ~1e-7 (within f32 noise).
        return jnp.where(v > 0, v, jnp.exp(jnp.minimum(v, 0.0)) - 1.0)

    # fc1 + ELU
    h1 = elu(jnp.dot(xn, w1_ref[...], preferred_element_type=jnp.float32)
             + slab_ref[2:3, :])

    # fc2 as two accumulated dots: hidden part + action part.  The action
    # weights sit at the actions' lane offsets inside w2a, so the raw packed
    # input slab is reused directly (no lane concat, no (2P, P) weight).
    h2 = elu(jnp.dot(h1, w2h_ref[...], preferred_element_type=jnp.float32)
             + jnp.dot(x, w2a_ref[...], preferred_element_type=jnp.float32)
             + slab_ref[3:4, :])

    # fc3 (out_fn = identity); store only the real out_dim lanes.
    y = jnp.dot(h2, w3_ref[...], preferred_element_type=jnp.float32) + slab_ref[4:5, :]
    out_ref[...] = y[:, :out_ref.shape[1]]


# -----------------------------------------------------------------------------
# Wrapper
# -----------------------------------------------------------------------------
def critic_forward(state, actions, packed, *, eps=1e-5, block_b=None):
    B, D = state.shape
    A = actions.shape[1]
    P = packed["w1"].shape[0]          # common padded lane width
    out_dim = packed["out_dim"]

    sf = state.astype(jnp.float32)
    af = actions.astype(jnp.float32)

    # --- BatchNorm batch statistics (two-pass, matches PyTorch) in plain XLA,
    #     folded with gamma/beta into a single per-feature scale/shift. -------
    mean = jnp.mean(sf, axis=0, keepdims=True)
    var = jnp.mean((sf - mean) ** 2, axis=0, keepdims=True)
    scale = packed["gamma"] * jax.lax.rsqrt(var + eps)         # (1, D)
    shift = packed["beta"] - mean * scale                       # (1, D)

    def row(v, n):
        return jnp.zeros((1, P), jnp.float32).at[:, :n].set(v)

    slab = jnp.concatenate(
        [row(scale, D), row(shift, D), packed["bias_rows"],
         jnp.zeros((3, P), jnp.float32)], axis=0)               # (8, P)

    # --- One packed input slab: state in lanes [0, D), actions in [D, D+A). --
    if block_b is None:
        block_b = _choose_block_b(B)
    Bp = _round_up(B, block_b)                                   # ragged batch -> pad
    in_slab = jnp.zeros((Bp, P), jnp.float32)
    in_slab = in_slab.at[:B, :D].set(sf)
    in_slab = in_slab.at[:B, D:D + A].set(af)

    grid = (Bp // block_b,)
    out = pl.pallas_call(
        critic_kernel,
        out_shape=jax.ShapeDtypeStruct((Bp, out_dim), jnp.float32),
        grid=grid,
        in_specs=[
            pl.BlockSpec((block_b, P), lambda i: (i, 0)),   # packed state|actions tile
            pl.BlockSpec((8, P), lambda i: (0, 0)),         # scale/shift/bias slab (resident)
            pl.BlockSpec((P, P), lambda i: (0, 0)),         # w1 (resident)
            pl.BlockSpec((P, P), lambda i: (0, 0)),         # w2, h1 part (resident)
            pl.BlockSpec((P, P), lambda i: (0, 0)),         # w2, action part (resident)
            pl.BlockSpec((P, P), lambda i: (0, 0)),         # w3 (resident)
        ],
        out_specs=pl.BlockSpec((block_b, out_dim), lambda i: (i, 0)),
        compiler_params=pltpu.CompilerParams(
            dimension_semantics=("parallel",)),              # shards across v7x's 2 TCs
    )(in_slab, slab, packed["w1"], packed["w2h"], packed["w2a"], packed["w3"])

    return out[:B] if Bp != B else out


# -----------------------------------------------------------------------------
# Parameter construction
# -----------------------------------------------------------------------------
def init_params(key, input_dim, out_dim, action_size, hidden_dim):
    """PyTorch Linear-default-style init; weights stored as (in, out) == W^T."""
    ks = jax.random.split(key, 6)

    def lin(kw, kb, fan_in, fan_out):
        bound = 1.0 / float(fan_in) ** 0.5
        w = jax.random.uniform(kw, (fan_in, fan_out), jnp.float32, -bound, bound)
        b = jax.random.uniform(kb, (1, fan_out), jnp.float32, -bound, bound)
        return w, b

    w1, b1 = lin(ks[0], ks[1], input_dim, hidden_dim)
    w2, b2 = lin(ks[2], ks[3], hidden_dim + action_size, hidden_dim)
    w3, b3 = lin(ks[4], ks[5], hidden_dim, out_dim)
    return {
        "gamma": jnp.ones((1, input_dim), jnp.float32),   # BatchNorm1d affine defaults
        "beta": jnp.zeros((1, input_dim), jnp.float32),
        "w1": w1, "b1": b1, "w2": w2, "b2": b2, "w3": w3, "b3": b3,
    }


def pack_params(raw, *, input_dim, out_dim, action_size, hidden_dim):
    """Zero-pad weights to a common lane width P and pre-split fc2 into its
    hidden-input part and action-input part (action rows placed at the
    actions' lane offsets of the packed input slab)."""
    D, H, A, O = input_dim, hidden_dim, action_size, out_dim
    P = _round_up(max(D + A, H, O), LANE)

    def row(v, n):
        return jnp.zeros((1, P), jnp.float32).at[:, :n].set(v)

    w1 = jnp.zeros((P, P), jnp.float32).at[:D, :H].set(raw["w1"])
    w2h = jnp.zeros((P, P), jnp.float32).at[:H, :H].set(raw["w2"][:H])
    w2a = jnp.zeros((P, P), jnp.float32).at[D:D + A, :H].set(raw["w2"][H:])
    w3 = jnp.zeros((P, P), jnp.float32).at[:H, :O].set(raw["w3"])

    bias_rows = jnp.concatenate(
        [row(raw["b1"], H), row(raw["b2"], H), row(raw["b3"], O)], axis=0)  # (3, P)

    return {
        "gamma": raw["gamma"], "beta": raw["beta"], "bias_rows": bias_rows,
        "w1": w1, "w2h": w2h, "w2a": w2a, "w3": w3, "out_dim": O,
    }


# -----------------------------------------------------------------------------
# Pure-JAX reference (unpadded) for correctness checking
# -----------------------------------------------------------------------------
def critic_reference(state, actions, raw, eps=1e-5):
    mean = jnp.mean(state, axis=0, keepdims=True)
    var = jnp.mean((state - mean) ** 2, axis=0, keepdims=True)
    xn = (state - mean) / jnp.sqrt(var + eps) * raw["gamma"] + raw["beta"]
    elu = lambda v: jnp.where(v > 0, v, jnp.exp(jnp.minimum(v, 0.0)) - 1.0)
    h1 = elu(xn @ raw["w1"] + raw["b1"])
    xj = jnp.concatenate([h1, actions], axis=1)
    h2 = elu(xj @ raw["w2"] + raw["b2"])
    return h2 @ raw["w3"] + raw["b3"]


if __name__ == "__main__":
    # Keep both the kernel's and the reference's f32 matmuls at full precision
    # so the correctness check is tight (kept f32 end-to-end for parity with
    # the fp32 PyTorch reference; bf16 operands are a v6e/v7x-only option).
    jax.config.update("jax_default_matmul_precision", "highest")

    B, input_dim, action_size, hidden_dim, out_dim = 32, 32, 8, 128, 4

    key = jax.random.PRNGKey(0)
    k_state, k_act, k_params = jax.random.split(key, 3)
    state = jax.random.normal(k_state, (B, input_dim), jnp.float32)
    actions = jax.random.normal(k_act, (B, action_size), jnp.float32)

    raw = init_params(k_params, input_dim, out_dim, action_size, hidden_dim)
    packed = pack_params(raw, input_dim=input_dim, out_dim=out_dim,
                         action_size=action_size, hidden_dim=hidden_dim)

    out = critic_forward(state, actions, packed)     # block_b auto -> 16 (2 parallel steps)
    out = jax.block_until_ready(out)

    ref = critic_reference(state, actions, raw)
    assert out.shape == (B, out_dim)
    err = float(jnp.max(jnp.abs(out - ref)))
    assert jnp.allclose(out, ref, atol=2e-3, rtol=2e-3), f"max abs err = {err}"
    print("KERNEL_OK")
</pallas_src>

<mosaic_0001>
module attributes {stable_mosaic.version = 11 : i64} {
  func.func @critic_kernel(%arg0: i32, %arg1: memref<16x128xf32, #tpu.memory_space<vmem>>, %arg2: memref<8x128xf32, #tpu.memory_space<vmem>>, %arg3: memref<128x128xf32, #tpu.memory_space<vmem>>, %arg4: memref<128x128xf32, #tpu.memory_space<vmem>>, %arg5: memref<128x128xf32, #tpu.memory_space<vmem>>, %arg6: memref<128x128xf32, #tpu.memory_space<vmem>>, %arg7: memref<16x4xf32, #tpu.memory_space<vmem>>) attributes {dimension_semantics = [#tpu.dimension_semantics<parallel>], iteration_bounds = array<i64: 2>, scalar_prefetch = 0 : i64, scratch_operands = 0 : i64, tpu.core_type = #tpu.core_type<tc>, window_params = [{transform_indices = @transform_0, window_bounds = array<i64: 16, 128>}, {pipeline_mode = #tpu.pipeline_mode<synchronous>, transform_indices = @transform_1, window_bounds = array<i64: 8, 128>}, {pipeline_mode = #tpu.pipeline_mode<synchronous>, transform_indices = @transform_2, window_bounds = array<i64: 128, 128>}, {pipeline_mode = #tpu.pipeline_mode<synchronous>, transform_indices = @transform_3, window_bounds = array<i64: 128, 128>}, {pipeline_mode = #tpu.pipeline_mode<synchronous>, transform_indices = @transform_4, window_bounds = array<i64: 128, 128>}, {pipeline_mode = #tpu.pipeline_mode<synchronous>, transform_indices = @transform_5, window_bounds = array<i64: 128, 128>}, {transform_indices = @transform_6, window_bounds = array<i64: 16, 4>}]} {
    %c0 = arith.constant 0 : index
    %c0_0 = arith.constant 0 : index
    %0 = vector.load %arg1[%c0, %c0_0] : memref<16x128xf32, #tpu.memory_space<vmem>>, vector<16x128xf32>
    %c0_1 = arith.constant 0 : index
    %c0_2 = arith.constant 0 : index
    %1 = vector.load %arg2[%c0_1, %c0_2] : memref<8x128xf32, #tpu.memory_space<vmem>>, vector<1x128xf32>
    %2 = vector.broadcast %1 : vector<1x128xf32> to vector<16x128xf32>
    %3 = arith.mulf %0, %2 : vector<16x128xf32>
    %c1 = arith.constant 1 : index
    %c0_3 = arith.constant 0 : index
    %4 = vector.load %arg2[%c1, %c0_3] : memref<8x128xf32, #tpu.memory_space<vmem>>, vector<1x128xf32>
    %5 = vector.broadcast %4 : vector<1x128xf32> to vector<16x128xf32>
    %6 = arith.addf %3, %5 : vector<16x128xf32>
    %c0_4 = arith.constant 0 : index
    %c0_5 = arith.constant 0 : index
    %7 = vector.load %arg3[%c0_4, %c0_5] : memref<128x128xf32, #tpu.memory_space<vmem>>, vector<128x128xf32>
    %cst = arith.constant dense<0.000000e+00> : vector<16x128xf32>
    %8 = tpu.matmul %6, %7, %cst {dimension_numbers = #tpu.dot_dimension_numbers<[1], [0], [0], [1], [0, 0, 1, 1], [], []>, precision = #tpu.contract_precision<fp32>} : vector<16x128xf32>, vector<128x128xf32>, vector<16x128xf32> -> vector<16x128xf32>
    %c2 = arith.constant 2 : index
    %c0_6 = arith.constant 0 : index
    %9 = vector.load %arg2[%c2, %c0_6] : memref<8x128xf32, #tpu.memory_space<vmem>>, vector<1x128xf32>
    %10 = vector.broadcast %9 : vector<1x128xf32> to vector<16x128xf32>
    %11 = arith.addf %8, %10 : vector<16x128xf32>
    %cst_7 = arith.constant 0.000000e+00 : f32
    %12 = vector.broadcast %cst_7 : f32 to vector<16x128xf32>
    %13 = arith.cmpf ogt, %11, %12 : vector<16x128xf32>
    %cst_8 = arith.constant 0.000000e+00 : f32
    %14 = vector.broadcast %cst_8 : f32 to vector<16x128xf32>
    %15 = arith.minimumf %11, %14 : vector<16x128xf32>
    %16 = math.exp %15 : vector<16x128xf32>
    %cst_9 = arith.constant 1.000000e+00 : f32
    %17 = vector.broadcast %cst_9 : f32 to vector<16x128xf32>
    %18 = arith.subf %16, %17 : vector<16x128xf32>
    %19 = arith.select %13, %11, %18 : vector<16x128xi1>, vector<16x128xf32>
    %c0_10 = arith.constant 0 : index
    %c0_11 = arith.constant 0 : index
    %20 = vector.load %arg4[%c0_10, %c0_11] : memref<128x128xf32, #tpu.memory_space<vmem>>, vector<128x128xf32>
    %cst_12 = arith.constant dense<0.000000e+00> : vector<16x128xf32>
    %21 = tpu.matmul %19, %20, %cst_12 {dimension_numbers = #tpu.dot_dimension_numbers<[1], [0], [0], [1], [0, 0, 1, 1], [], []>, precision = #tpu.contract_precision<fp32>} : vector<16x128xf32>, vector<128x128xf32>, vector<16x128xf32> -> vector<16x128xf32>
    %c0_13 = arith.constant 0 : index
    %c0_14 = arith.constant 0 : index
    %22 = vector.load %arg5[%c0_13, %c0_14] : memref<128x128xf32, #tpu.memory_space<vmem>>, vector<128x128xf32>
    %cst_15 = arith.constant dense<0.000000e+00> : vector<16x128xf32>
    %23 = tpu.matmul %0, %22, %cst_15 {dimension_numbers = #tpu.dot_dimension_numbers<[1], [0], [0], [1], [0, 0, 1, 1], [], []>, precision = #tpu.contract_precision<fp32>} : vector<16x128xf32>, vector<128x128xf32>, vector<16x128xf32> -> vector<16x128xf32>
    %24 = arith.addf %21, %23 : vector<16x128xf32>
    %c3 = arith.constant 3 : index
    %c0_16 = arith.constant 0 : index
    %25 = vector.load %arg2[%c3, %c0_16] : memref<8x128xf32, #tpu.memory_space<vmem>>, vector<1x128xf32>
    %26 = vector.broadcast %25 : vector<1x128xf32> to vector<16x128xf32>
    %27 = arith.addf %24, %26 : vector<16x128xf32>
    %cst_17 = arith.constant 0.000000e+00 : f32
    %28 = vector.broadcast %cst_17 : f32 to vector<16x128xf32>
    %29 = arith.cmpf ogt, %27, %28 : vector<16x128xf32>
    %cst_18 = arith.constant 0.000000e+00 : f32
    %30 = vector.broadcast %cst_18 : f32 to vector<16x128xf32>
    %31 = arith.minimumf %27, %30 : vector<16x128xf32>
    %32 = math.exp %31 : vector<16x128xf32>
    %cst_19 = arith.constant 1.000000e+00 : f32
    %33 = vector.broadcast %cst_19 : f32 to vector<16x128xf32>
    %34 = arith.subf %32, %33 : vector<16x128xf32>
    %35 = arith.select %29, %27, %34 : vector<16x128xi1>, vector<16x128xf32>
    %c0_20 = arith.constant 0 : index
    %c0_21 = arith.constant 0 : index
    %36 = vector.load %arg6[%c0_20, %c0_21] : memref<128x128xf32, #tpu.memory_space<vmem>>, vector<128x128xf32>
    %cst_22 = arith.constant dense<0.000000e+00> : vector<16x128xf32>
    %37 = tpu.matmul %35, %36, %cst_22 {dimension_numbers = #tpu.dot_dimension_numbers<[1], [0], [0], [1], [0, 0, 1, 1], [], []>, precision = #tpu.contract_precision<fp32>} : vector<16x128xf32>, vector<128x128xf32>, vector<16x128xf32> -> vector<16x128xf32>
    %c4 = arith.constant 4 : index
    %c0_23 = arith.constant 0 : index
    %38 = vector.load %arg2[%c4, %c0_23] : memref<8x128xf32, #tpu.memory_space<vmem>>, vector<1x128xf32>
    %39 = vector.broadcast %38 : vector<1x128xf32> to vector<16x128xf32>
    %40 = arith.addf %37, %39 : vector<16x128xf32>
    %41 = vector.extract_strided_slice %40 {offsets = [0, 0], sizes = [16, 4], strides = [1, 1]} : vector<16x128xf32> to vector<16x4xf32>
    %c0_24 = arith.constant 0 : index
    %c0_25 = arith.constant 0 : index
    %42 = vector.load %arg7[%c0_24, %c0_25] : memref<16x4xf32, #tpu.memory_space<vmem>>, vector<16x4xf32>
    tpu.vector_store %arg7[%c0_24, %c0_25], %41 {strides = array<i32>} : memref<16x4xf32, #tpu.memory_space<vmem>>, vector<16x4xf32>,
    return
  }
  func.func @transform_0(%arg0: i32) -> (i32, i32) {
    %c0_i32 = arith.constant 0 : i32
    %c0_i32_0 = arith.constant 0 : i32
    return %arg0, %c0_i32 : i32, i32
  }
  func.func @transform_1(%arg0: i32) -> (i32, i32) {
    %c0_i32 = arith.constant 0 : i32
    %c0_i32_0 = arith.constant 0 : i32
    %c0_i32_1 = arith.constant 0 : i32
    return %c0_i32, %c0_i32_0 : i32, i32
  }
  func.func @transform_2(%arg0: i32) -> (i32, i32) {
    %c0_i32 = arith.constant 0 : i32
    %c0_i32_0 = arith.constant 0 : i32
    %c0_i32_1 = arith.constant 0 : i32
    return %c0_i32, %c0_i32_0 : i32, i32
  }
  func.func @transform_3(%arg0: i32) -> (i32, i32) {
    %c0_i32 = arith.constant 0 : i32
    %c0_i32_0 = arith.constant 0 : i32
    %c0_i32_1 = arith.constant 0 : i32
    return %c0_i32, %c0_i32_0 : i32, i32
  }
  func.func @transform_4(%arg0: i32) -> (i32, i32) {
    %c0_i32 = arith.constant 0 : i32
    %c0_i32_0 = arith.constant 0 : i32
    %c0_i32_1 = arith.constant 0 : i32
    return %c0_i32, %c0_i32_0 : i32, i32
  }
  func.func @transform_5(%arg0: i32) -> (i32, i32) {
    %c0_i32 = arith.constant 0 : i32
    %c0_i32_0 = arith.constant 0 : i32
    %c0_i32_1 = arith.constant 0 : i32
    return %c0_i32, %c0_i32_0 : i32, i32
  }
  func.func @transform_6(%arg0: i32) -> (i32, i32) {
    %c0_i32 = arith.constant 0 : i32
    %c0_i32_0 = arith.constant 0 : i32
    return %arg0, %c0_i32 : i32, i32
  }
}

</mosaic_0001>

<bundles_post_ra>
// kernel: tpu_custom_call.1
= control target key start
LH: loop header
LB: loop body
LE: loop exit
PB: predicated region body
PF: predicated region fallthrough
CT: control target
= control target key end

     0   :  { %11 = vsyncpa [#allocation3], 0  ;;  %s7155_s0 = inlined_call_operand.hbm [shape: f32[32,128], index: 0, kind: input, shape index: {}]   ;;  %s7156_s1 = inlined_call_operand.hbm [shape: f32[8,128], index: 1, kind: input, shape index: {}]   ;;  %s7157_s2 = inlined_call_operand.hbm [shape: f32[128,128], index: 2, kind: input, shape index: {}]   ;;  %s7158_s3 = inlined_call_operand.hbm [shape: f32[128,128], index: 3, kind: input, shape index: {}]   ;;  %s7159_s4 = inlined_call_operand.hbm [shape: f32[128,128], index: 4, kind: input, shape index: {}]   ;;  %s7160_s5 = inlined_call_operand.hbm [shape: f32[128,128], index: 5, kind: input, shape index: {}]   ;;  %s7161_s6 = inlined_call_operand.vmem [shape: f32[32,4], index: 6, kind: output, shape index: {}]  }
   0x1   :  { %13 = vsyncpa [#allocation3 + $0x1], 0 }
   0x2   :  { %14 = vsyncpa [#allocation5], 0 }
   0x3   :  { %15 = vsyncpa [#allocation8], 0 }
   0x4   :  { %16 = vsyncpa [#allocation11], 0  ;;  %s5800_s21 = smov 0   ;;  %s5802_s22 = smov 0  }
   0x5   :  { %s5804_s23 = smov 0   ;;  %s5806_s24 = smov 0  }
   0x6 LB: > { %s5757_s25 = smov [#allocation4]   ;;  %s3320_s27 = sadd.s32 4294967295, %s5755_s24   ;;  %s5755_s24 = sphi %s5806_s24, %s7282_s24   ;;  %s5751_s23 = sphi %s5804_s23, %s7281_s23   ;;  %s5747_s22 = sphi %s5802_s22, %s7280_s22   ;;  %s5743_s21 = sphi %s5800_s21, %s7279_s21  }
   0x7   : > { %s197_s26 = sshll.u32 %s5757_s25, 4  ;;  %p3322_p0 = scmp.ge.s32.totalorder %s5755_s24, 1  ;;  %s198_s26 = int_to_ptr.vmem [resolvable:$true] %s197_s26 }
   0x8   : > { %p5824_p1 = scmp.eq.s32.totalorder %s3320_s27, 0  ;;  %p184_p2 = scmp.lt.s32.totalorder %s5755_s24, 3 }
   0x9   : > { %s5758_s30 = smov [#allocation7]   ;;  %s5759_s9 = smov [#allocation6]  }
   0xa   : > { %s7212_s28 = scalar_select %p5824_p1, 1, 0 }
   0xb   : > { %p5829_p3 = pnand %p3322_p0, %p184_p2  ;;  %s220_s7 = sshll.u32 %s5758_s30, 4  ;;  %s5841_s7 = int_to_ptr.vmem [resolvable:$true] %s220_s7 }
   0xc   : > { %s207_s10 = sshll.u32 %s5759_s9, 4  ;;  %s5539_s13 = scalar_lea.hbm %s7156_s1, 128  ;;  %s5843_s10 = int_to_ptr.vmem [resolvable:$true] %s207_s10 }
   0xd   : > { %s7213_s29 = scalar_select %p5829_p3, 1, 0 }
   0xe   : > { %p5461_p4 = pneg %p5829_p3  ;;  %p5540_p6 = scmp.ne.s32.totalorder %s7156_s1, %s5539_s13 }
   0xf   : > { %p5546_p10 = scmp.lt.u32.totalorder %s5539_s13, %s7156_s1 }
  0x10   : > { %p5837_p5 = pnand %p5461_p4, %p5824_p1 }
  0x12   : > { %p5853_p7 = pneg %p5837_p5 }
  0x14   : > { %p5542_p8 = pnand %p5853_p7, %p5540_p6 }
  0x16   : > { %p5543_p9 = pneg %p5542_p8 }
  0x18   : > { %p5548_p11 = pnand %p5546_p10, %p5543_p9 }
  0x1a   : > { %5551 = shalt.err (!%p5548_p11)
}
  0x1b   : > { %s5552_s19 = scalar_lea.vmem %s198_s26, 128  ;;  %p5560_p2 = scmp.lt.s32.totalorder %s198_s26, %s198_s26 }
  0x1c   : > { %p5553_p12 = scmp.ne.s32.totalorder %s198_s26, %s5552_s19  ;;  %p5561_p4 = scmp.lt.s32.totalorder %s5552_s19, %s5552_s19 }
  0x1e   : > { %p5555_p13 = pnand %p5553_p12, %p5853_p7  ;;  %p5562_p3 = por %p5561_p4, %p5560_p2 }
  0x20   : > { %p5556_p0 = pneg %p5555_p13 }
  0x22   : > { %p5563_p1 = pnand %p5562_p3, %p5556_p0 }
  0x24   : > { %5566 = shalt.err (!%p5563_p1)
}
  0x25   : > { %5464 = dma.hbm_to_vmem [thread:$0]  (!%p5837_p5), %s7156_s1, 128, %s198_s26, [#allocation5]  }
  0x26   : > { %s5567_s11 = scalar_lea.hbm %s7158_s3, 2048 }
  0x27   : > { %p5568_p6 = scmp.ne.s32.totalorder %s7158_s3, %s5567_s11  ;;  %p5574_p1 = scmp.lt.u32.totalorder %s5567_s11, %s7158_s3 }
  0x29   : > { %p5570_p8 = pnand %p5568_p6, %p5853_p7 }
  0x2b   : > { %p5571_p9 = pneg %p5570_p8 }
  0x2d   : > { %p5576_p3 = pnand %p5574_p1, %p5571_p9 }
  0x2f   : > { %5579 = shalt.err (!%p5576_p3)
}
  0x30   : > { %s5580_s26 = scalar_lea.vmem %s5841_s7, 2048  ;;  %p5588_p13 = scmp.lt.s32.totalorder %s5841_s7, %s5841_s7 }
  0x31   : > { %p5581_p10 = scmp.ne.s32.totalorder %s5841_s7, %s5580_s26  ;;  %p5589_p0 = scmp.lt.s32.totalorder %s5580_s26, %s5580_s26 }
  0x33   : > { %p5583_p11 = pnand %p5581_p10, %p5853_p7  ;;  %p5590_p2 = por %p5589_p0, %p5588_p13 }
  0x35   : > { %p5584_p12 = pneg %p5583_p11 }
  0x37   : > { %p5591_p4 = pnand %p5590_p2, %p5584_p12 }
  0x39   : > { %5594 = shalt.err (!%p5591_p4)
}
  0x3a   : > { %s5760_s17 = smov 128   ;;  %s5761_s18 = smov 8  }
  0x3b   : > { %5470 = dma.hbm_to_vmem [thread:$0]  (!%p5837_p5), %s7158_s3, 2048, %s5841_s7, [#allocation8], %s5760_s17, %s5760_s17, %s5761_s18  }
  0x3c   : > { %s5595_s9 = scalar_lea.hbm %s7157_s2, 2048 }
  0x3d   : > { %p5596_p6 = scmp.ne.s32.totalorder %s7157_s2, %s5595_s9  ;;  %p5602_p1 = scmp.lt.u32.totalorder %s5595_s9, %s7157_s2 }
  0x3f   : > { %p5598_p8 = pnand %p5596_p6, %p5853_p7 }
  0x41   : > { %p5599_p9 = pneg %p5598_p8 }
  0x43   : > { %p5604_p3 = pnand %p5602_p1, %p5599_p9 }
  0x45   : > { %5607 = shalt.err (!%p5604_p3)
}
  0x46   : > { %s5608_s7 = scalar_lea.vmem %s5843_s10, 2048  ;;  %p5616_p13 = scmp.lt.s32.totalorder %s5843_s10, %s5843_s10 }
  0x47   : > { %p5609_p10 = scmp.ne.s32.totalorder %s5843_s10, %s5608_s7  ;;  %p5617_p0 = scmp.lt.s32.totalorder %s5608_s7, %s5608_s7 }
  0x49   : > { %p5611_p11 = pnand %p5609_p10, %p5853_p7  ;;  %p5618_p2 = por %p5617_p0, %p5616_p13 }
  0x4b   : > { %p5612_p12 = pneg %p5611_p11 }
  0x4d   : > { %p5619_p4 = pnand %p5618_p2, %p5612_p12 }
  0x4f   : > { %5622 = shalt.err (!%p5619_p4)
}
  0x50   : > { %5467 = dma.hbm_to_vmem [thread:$0]  (!%p5837_p5), %s7157_s2, 2048, %s5843_s10, [#allocation5], %s5760_s17, %s5760_s17, %s5761_s18  }
  0x51   : > { %s5762_s19 = smov [#allocation9]   ;;  %s5763_s25 = smov [#allocation10]  }
  0x52   : > { %s233_s20 = sshll.u32 %s5762_s19, 4  ;;  %s246_s30 = sshll.u32 %s5763_s25, 4  ;;  %s234_s20 = int_to_ptr.vmem [resolvable:$true] %s233_s20  ;;  %s247_s30 = int_to_ptr.vmem [resolvable:$true] %s246_s30 }
  0x53   : > { %s5623_s12 = scalar_lea.hbm %s7159_s4, 2048 }
  0x54   : > { %p5624_p6 = scmp.ne.s32.totalorder %s7159_s4, %s5623_s12  ;;  %p5630_p1 = scmp.lt.u32.totalorder %s5623_s12, %s7159_s4 }
  0x56   : > { %p5626_p8 = pnand %p5624_p6, %p5853_p7 }
  0x58   : > { %p5627_p9 = pneg %p5626_p8 }
  0x5a   : > { %p5632_p3 = pnand %p5630_p1, %p5627_p9 }
  0x5c   : > { %5635 = shalt.err (!%p5632_p3)
}
  0x5d   : > { %s5636_s10 = scalar_lea.vmem %s234_s20, 2048  ;;  %p5644_p13 = scmp.lt.s32.totalorder %s234_s20, %s234_s20 }
  0x5e   : > { %p5637_p10 = scmp.ne.s32.totalorder %s234_s20, %s5636_s10  ;;  %p5645_p0 = scmp.lt.s32.totalorder %s5636_s10, %s5636_s10 }
  0x60   : > { %p5639_p11 = pnand %p5637_p10, %p5853_p7  ;;  %p5646_p2 = por %p5645_p0, %p5644_p13 }
  0x62   : > { %p5640_p12 = pneg %p5639_p11 }
  0x64   : > { %p5647_p4 = pnand %p5646_p2, %p5640_p12 }
  0x66   : > { %5650 = shalt.err (!%p5647_p4)
}
  0x67   : > { %5473 = dma.hbm_to_vmem [thread:$0]  (!%p5837_p5), %s7159_s4, 2048, %s234_s20, [#allocation8], %s5760_s17, %s5760_s17, %s5761_s18  }
  0x68   : > { %s5651_s11 = scalar_lea.hbm %s7160_s5, 2048 }
  0x69   : > { %p5652_p6 = scmp.ne.s32.totalorder %s7160_s5, %s5651_s11  ;;  %p5658_p1 = scmp.lt.u32.totalorder %s5651_s11, %s7160_s5 }
  0x6b   : > { %p5654_p8 = pnand %p5652_p6, %p5853_p7 }
  0x6d   : > { %p5655_p9 = pneg %p5654_p8 }
  0x6f   : > { %p5660_p3 = pnand %p5658_p1, %p5655_p9 }
  0x71   : > { %5663 = shalt.err (!%p5660_p3)
}
  0x72   : > { %s5664_s15 = scalar_lea.vmem %s247_s30, 2048  ;;  %p5672_p13 = scmp.lt.s32.totalorder %s247_s30, %s247_s30 }
  0x73   : > { %p5665_p10 = scmp.ne.s32.totalorder %s247_s30, %s5664_s15  ;;  %p5673_p0 = scmp.lt.s32.totalorder %s5664_s15, %s5664_s15 }
  0x75   : > { %p5667_p11 = pnand %p5665_p10, %p5853_p7  ;;  %p5674_p2 = por %p5673_p0, %p5672_p13 }
  0x77   : > { %p5668_p12 = pneg %p5667_p11 }
  0x79   : > { %p5675_p4 = pnand %p5674_p2, %p5668_p12 }
  0x7b   : > { %5678 = shalt.err (!%p5675_p4)
}
  0x7c   : > { %5476 = dma.hbm_to_vmem [thread:$0]  (!%p5837_p5), %s7160_s5, 2048, %s247_s30, [#allocation11], %s5760_s17, %s5760_s17, %s5761_s18  }
  0x7d   : > { %s5964_s8 = sadd.s32 1, %s5755_s24   ;;  %s29_s26 = sadd.s32 1, %s5751_s23 }
  0x7e   : > { %s26_s16 = ssub.s32 %s5755_s24, %s5964_s8  ;;  %p36_p6 = scmp.ne.s32.totalorder %s5751_s23, %s5747_s22 }
  0x7f   : > { %p27_p7 = scmp.eq.s32.totalorder %s26_s16, 0  ;;  %p37_p8 = scmp.eq.s32.totalorder %s5755_s24, 0 }
  0x80   : > { %p42_p9 = scmp.ne.s32.totalorder %s5747_s22, %s5743_s21  ;;  %p7216_p3 = scmp.ne.s32.totalorder %s7212_s28, 0 }
  0x81   : > { %s5975_s19 = scalar_select %p27_p7, %s5751_s23, %s29_s26  }
  0x82   : > { %p38_p1 = por %p37_p8, %p36_p6  ;;  %p5979_p10 = por %p7216_p3, %p42_p9 }
  0x83   : > { %p5486_p11 = scmp.lt.s32.totalorder %s5755_s24, 2  ;;  %s260_s9 = sand.u32 1, %s5751_s23  }
  0x84   : > { %s3329_s30 = sshll.u32 %s260_s9, 4  ;;  %s3352_s11 = sshll.u32 %s5755_s24, 8 }
  0x85   : > { %s5989_s14 = scalar_lea.hbm %s7155_s0, %s3352_s11  ;;  %s264_s21 = scalar_lea.vmem [#allocation2], %s3329_s30 }
  0x86   : > { %s271_s7 = sshll.u32 %s264_s21, 4  ;;  %p5993_p5 = pnand %p5486_p11, %p38_p1  ;;  %s5991_s7 = int_to_ptr.vmem [resolvable:$true] %s271_s7 }
  0x87   : > { %s5997_s20 = scalar_lea.sflag [#allocation3], %s260_s9  ;;  %s5679_s10 = scalar_lea.hbm %s5989_s14, 256 }
  0x88   : > { %p5680_p12 = scmp.ne.s32.totalorder %s5989_s14, %s5679_s10  ;;  %p5681_p13 = pneg %p5993_p5 }
  0x89   : > { %s5684_s30 = scalar_lea.hbm %s7155_s0, 512  ;;  %p5685_p4 = scmp.lt.u32.totalorder %s5989_s14, %s7155_s0 }
  0x8a   : > { %p5682_p0 = pnand %p5681_p13, %p5680_p12  ;;  %p5686_p7 = scmp.lt.u32.totalorder %s5684_s30, %s5679_s10 }
  0x8b   : > { %p5688_p8 = scmp.lt.u32.totalorder %s5679_s10, %s5989_s14 }
  0x8c   : > { %p5683_p2 = pneg %p5682_p0  ;;  %p5687_p6 = por %p5686_p7, %p5685_p4 }
  0x8e   : > { %p5689_p9 = por %p5688_p8, %p5687_p6 }
  0x90   : > { %p5690_p1 = pnand %p5689_p9, %p5683_p2 }
  0x92   : > { %5693 = shalt.err (!%p5690_p1)
}
  0x93   : > { %s5694_s9 = scalar_lea.vmem %s5991_s7, 256  ;;  %s5764_s13 = smov [#allocation2]  }
  0x94   : > { %p5695_p3 = scmp.ne.s32.totalorder %s5991_s7, %s5694_s9  ;;  %s5699_s21 = sshll.u32 %s5764_s13, 4  ;;  %s5700_s21 = int_to_ptr.vmem [resolvable:$false] %s5699_s21 }
  0x95   : > { %s5701_s16 = scalar_lea.vmem %s5700_s21, 512  ;;  %p5702_p0 = scmp.lt.s32.totalorder %s5991_s7, %s5700_s21 }
  0x96   : > { %p5697_p11 = pnand %p5695_p3, %p5681_p13  ;;  %p5703_p4 = scmp.lt.s32.totalorder %s5701_s16, %s5694_s9 }
  0x98   : > { %p5698_p12 = pneg %p5697_p11  ;;  %p5704_p7 = por %p5703_p4, %p5702_p0 }
  0x9a   : > { %p5705_p6 = pnand %p5704_p7, %p5698_p12 }
  0x9c   : > { %5708 = shalt.err (!%p5705_p6)
}
  0x9d   : > { %5480 = dma.hbm_to_vmem [thread:$0]  (!%p5993_p5), %s5989_s14, 256, %s5991_s7, %s5997_s20, %s5760_s17, %s5760_s17, %s5761_s18  }
  0x9e   : > { %p7219_p13 = scmp.ne.s32.totalorder %s7213_s29, 0 }
  0xa0   : > { %283 = sbr.rel (%p7219_p13) target bundleno = 1399 (0x577), region = 44 }
  0xa7   : > { %s285_s10 = sand.u32 1, %s5747_s22  }
  0xa8   : > { %s6031_s26 = sshll.u32 %s285_s10, 4  ;;  %s286_s30 = scalar_lea.sflag [#allocation3], %s285_s10 }
  0xa9   : > { %s289_s11 = scalar_lea.vmem [#allocation2], %s6031_s26 }
  0xaa   : > { %5726 = dma.done.wait (%p5979_p10), %s286_s30, 256  }
  0xab   : > { %5728 = vsyncadd (%p5979_p10), %s286_s30, 4294967040  ;;  %p7220_p2 = scmp.ne.s32.totalorder %s7212_s28, 0 }
  0xad   : > { %5730 = dma.done.wait (%p7220_p2), [#allocation5], 2176  }
  0xae   : > { %5732 = vsyncadd (%p7220_p2), [#allocation5], 4294965120 }
  0xaf   : > { %5734 = dma.done.wait (%p7220_p2), [#allocation8], 4096  }
  0xb0   : > { %5736 = vsyncadd (%p7220_p2), [#allocation8], 4294963200 }
  0xb1   : > { %5738 = dma.done.wait (%p7220_p2), [#allocation11], 2048  }
  0xb2   : > { %5740 = vsyncadd (%p7220_p2), [#allocation11], 4294965248  ;;  %v361_v0 = vld [vmem:[#allocation6] sm:$0xff]  ;;  %v362_v1 = vld [vmem:[#allocation6 + $0x8] sm:$0xff]  ;;  %s3339_s28 = sshll.u32 %s3320_s27, 1  ;;  %vm3202_vm4 = vcmask 31744  }
  0xb3   : > { %v363_v2 = vld [vmem:[#allocation6 + $0x10] sm:$0xff]  ;;  %v383_v3 = vand.u32 4294901760, %v361_v0  ;;  %v386_v4 = vand.u32 4294901760, %v362_v1  ;;  %v364_v5 = vld [vmem:[#allocation6 + $0x18] sm:$0xff]  ;;  %v365_v7 = vld [vmem:[#allocation6 + $0x20] sm:$0xff]  ;;  %p340_p10 = scmp.lt.s32.totalorder %s3339_s28, 3 }
  0xb4   : > { %v389_v6 = vand.u32 4294901760, %v363_v2  ;;  %v366_v8 = vld [vmem:[#allocation6 + $0x28] sm:$0xff]  ;;  %v392_v9 = vand.u32 4294901760, %v364_v5  ;;  %v395_v11 = vand.u32 4294901760, %v365_v7  ;;  %v6054_v14 = vld [vmem:[#allocation6 + $0x30] sm:$0xff]  ;;  %v6056_v15 = vld [vmem:[#allocation6 + $0x38] sm:$0xff] }
  0xb5   : > { %v6050_v10 = vpack.c.bf16 %v386_v4, %v383_v3  ;;  %v398_v12 = vand.u32 4294901760, %v366_v8  ;;  %v6059_v16 = vld [vmem:[%s289_s11] sm:$0xff]  ;;  %v6061_v17 = vld [vmem:[%s289_s11 + $0x8] sm:$0xff]  ;;  %v401_v21 = vand.u32 4294901760, %v6054_v14  ;;  %v404_v22 = vand.u32 4294901760, %v6056_v15  ;;  %s7284_s28 = smov (!%p340_p10, %s3339_s28), 3 }
  0xb6   : > { %v6052_v13 = vpack.c.bf16 %v392_v9, %v389_v6  ;;  %v3341_v18 = vld [vmem:[#allocation4] ss:$0 sm:$0xff]  ;;  %v3342_v19 = vld [vmem:[#allocation4 + $0x1] ss:$0 sm:$0xff]  ;;  %v369_v23 = vld [vmem:[#allocation6 + $0x40] sm:$0xff]  ;;  %v6072_v30 = vsub.f32 %v361_v0, %v383_v3  ;;  %v6079_v35 = vsub.f32 %v362_v1, %v386_v4  ;;  %v6091_v48 = vsub.f32 %v363_v2, %v389_v6  ;;  %s3340_s29 = sshll.u32 %s7284_s28, 3 }
  0xb7   : > { %4626 = vmatprep.subr.bf16.mxu0 %v6050_v10  ;;  %v6065_v20 = vpack.c.bf16 %v398_v12, %v395_v11  ;;  %v370_v24 = vld [vmem:[#allocation6 + $0x48] sm:$0xff]  ;;  %v352_v25 = vmul.f32 %v3341_v18, %v6059_v16  ;;  %v353_v26 = vmul.f32 %v3341_v18, %v6061_v17  ;;  %v407_v28 = vand.u32 4294901760, %v369_v23  ;;  %v371_v32 = vld [vmem:[#allocation6 + $0x50] sm:$0xff]  ;;  %v372_v33 = vld [vmem:[#allocation6 + $0x58] sm:$0xff]  ;;  %s343_s25 = scalar_lea.vmem %s7161_s6, %s3340_s29 }
  0xb8   : > { %4628 = vmatpush3.bf16.msra.mxu0 %v6050_v10  ;;  %v410_v29 = vand.u32 4294901760, %v370_v24  ;;  %v6075_v31 = vpack.c.bf16 %v404_v22, %v401_v21  ;;  %v373_v37 = vld [vmem:[#allocation6 + $0x60] sm:$0xff]  ;;  %v413_v40 = vand.u32 4294901760, %v371_v32  ;;  %v416_v41 = vand.u32 4294901760, %v372_v33  ;;  %v374_v42 = vld [vmem:[#allocation6 + $0x68] sm:$0xff]  ;;  %v375_v43 = vld [vmem:[#allocation6 + $0x70] sm:$0xff] }
  0xb9   : > { %4630 = vmatprep.subr.bf16.mxu0 %v6052_v13  ;;  %v359_v27 = vadd.f32 %v3342_v19, %v352_v25  ;;  %v360_v36 = vadd.f32 %v3342_v19, %v353_v26  ;;  %v376_v44 = vld [vmem:[#allocation6 + $0x78] sm:$0xff]  ;;  %v486_v45 = vand.u32 4294901760, %v6072_v30  ;;  %v493_v47 = vand.u32 4294901760, %v6079_v35 }
  0xba   : > { %v6085_v39 = vpack.c.bf16 %v410_v29, %v407_v28  ;;  %v6093_v49 = vsub.f32 %v364_v5, %v392_v9  ;;  %v419_v50 = vand.u32 4294901760, %v373_v37  ;;  %v422_v52 = vand.u32 4294901760, %v374_v42 }
  0xbb   : > { %v6077_v34 = vand.u32 4294901760, %v359_v27  ;;  %v6095_v51 = vand.u32 4294901760, %v360_v36  ;;  %v425_v53 = vand.u32 4294901760, %v375_v43  ;;  %v428_v54 = vand.u32 4294901760, %v376_v44 }
  0xbc   : > { %4632 = vmatpush3.bf16.msra.mxu0 %v6052_v13  ;;  %v6101_v56 = vpack.c.bf16 %v416_v41, %v413_v40  ;;  %v487_v57 = vsub.f32 %v6072_v30, %v486_v45  ;;  %v6106_v58 = vsub.f32 %v365_v7, %v395_v11  ;;  %v6108_v59 = vsub.f32 %v366_v8, %v398_v12 }
  0xbd   : > { %4634 = vmatprep.subr.bf16.mxu0 %v6065_v20  ;;  %v6082_v38 = vsub.f32 %v359_v27, %v6077_v34  ;;  %7221 = vst [vmem:[#allocation16_spill] sm:$0xff] %v6095_v51  ;;  %v494_v61 = vsub.f32 %v6079_v35, %v493_v47  ;;  %v500_v62 = vand.u32 4294901760, %v6091_v48  ;;  %v507_v63 = vand.u32 4294901760, %v6093_v49 }
  0xbe   : > { %v6115_v0 = vsub.f32 %v360_v36, %v6095_v51  ;;  %v6118_v1 = vpack.c.bf16 %v422_v52, %v419_v50  ;;  %v6120_v2 = vpack.c.bf16 %v428_v54, %v425_v53  ;;  %v488_v3 = vand.u32 4294901760, %v487_v57 }
  0xbf   : > { %v7166_v46 = vand.u32 4294901760, %v6082_v38  ;;  %v514_v4 = vand.u32 4294901760, %v6106_v58  ;;  %v495_v5 = vand.u32 4294901760, %v494_v61  ;;  %v501_v6 = vsub.f32 %v6091_v48, %v500_v62 }
  0xc0   : > { %4636 = vmatpush3.bf16.msra.mxu0 %v6065_v20  ;;  %v508_v7 = vsub.f32 %v6093_v49, %v507_v63  ;;  %v521_v8 = vand.u32 4294901760, %v6108_v59  ;;  %v7165_v9 = vand.u32 4294901760, %v6115_v0  ;;  %v6129_v11 = vsub.f32 %v6054_v14, %v401_v21 }
  0xc1   : > { %4638 = vmatprep.subr.bf16.mxu0 %v6075_v31  ;;  %v466_v55 = vsub.f32 %v6082_v38, %v7166_v46  ;;  %v6132_v12 = vsub.f32 %v6056_v15, %v404_v22  ;;  %v6134_v18 = vsub.f32 %v369_v23, %v407_v28  ;;  %v6136_v19 = vsub.f32 %v370_v24, %v410_v29 }
  0xc2   : > { %v6138_v25 = vsub.f32 %v371_v32, %v413_v40  ;;  %v6140_v26 = vsub.f32 %v372_v33, %v416_v41  ;;  %v6142_v27 = vsub.f32 %v373_v37, %v419_v50  ;;  %v515_v36 = vsub.f32 %v6106_v58, %v514_v4 }
  0xc3   : > { %v467_v60 = vand.u32 4294901760, %v466_v55  ;;  %v6146_v55 = vsub.f32 %v374_v42, %v422_v52  ;;  %v6148_v14 = vsub.f32 %v375_v43, %v425_v53  ;;  %v6150_v15 = vsub.f32 %v376_v44, %v428_v54 }
  0xc4   : > { %4640 = vmatpush3.bf16.msra.mxu0 %v6075_v31  ;;  %v4657_v21 = vpack.c.bf16 %v495_v5, %v488_v3  ;;  %v502_v22 = vand.u32 4294901760, %v501_v6  ;;  %v509_v23 = vand.u32 4294901760, %v508_v7  ;;  %v522_v24 = vsub.f32 %v6108_v59, %v521_v8 }
  0xc5   : > { %4642 = vmatprep.subr.bf16.mxu0 %v6085_v39  ;;  %3817 = vmatprep.mubr.f32.mxu0 %v467_v60  ;;  %v476_v28 = vsub.f32 %v6115_v0, %v7165_v9  ;;  %v528_v29 = vand.u32 4294901760, %v6129_v11  ;;  %v535_v32 = vand.u32 4294901760, %v6132_v12  ;;  %v542_v33 = vand.u32 4294901760, %v6134_v18 }
  0xc6   : > { %v549_v37 = vand.u32 4294901760, %v6136_v19  ;;  %v556_v40 = vand.u32 4294901760, %v6138_v25  ;;  %v563_v41 = vand.u32 4294901760, %v6140_v26  ;;  %v570_v42 = vand.u32 4294901760, %v6142_v27 }
  0xc7   : > { %v577_v43 = vand.u32 4294901760, %v6146_v55  ;;  %v584_v44 = vand.u32 4294901760, %v6148_v14  ;;  %v591_v50 = vand.u32 4294901760, %v6150_v15  ;;  %v6170_v52 = vpack.c.bf16 %v493_v47, %v486_v45 }
  0xc8   : > { %4644 = vmatpush3.bf16.msra.mxu0 %v6085_v39  ;;  %v6173_v53 = vpack.c.bf16 %v507_v63, %v500_v62  ;;  %v6175_v54 = vpack.c.bf16 %v521_v8, %v514_v4  ;;  %v6177_v57 = vpack.c.bf16 %v535_v32, %v528_v29  ;;  %v6179_v60 = vpack.c.bf16 %v549_v37, %v542_v33 }
  0xc9   : > { %4646 = vmatprep.subr.bf16.mxu0 %v6101_v56  ;;  %v6181_v61 = vpack.c.bf16 %v563_v41, %v556_v40  ;;  %v6183_v3 = vpack.c.bf16 %v577_v43, %v570_v42  ;;  %v6185_v5 = vpack.c.bf16 %v591_v50, %v584_v44  ;;  %v477_v6 = vand.u32 4294901760, %v476_v28 }
  0xca   : > { %7222 = vst [vmem:[#allocation17_spill] sm:$0xff] %v6177_v57  ;;  %7223 = vst [vmem:[#allocation18_spill] sm:$0xff] %v6179_v60  ;;  %v516_v45 = vand.u32 4294901760, %v515_v36  ;;  %v523_v47 = vand.u32 4294901760, %v522_v24  ;;  %v4661_v62 = vpack.c.bf16 %v509_v23, %v502_v22  ;;  %v529_v63 = vsub.f32 %v6129_v11, %v528_v29 }
  0xcb   : > { %7224 = vst [vmem:[#allocation19_spill] sm:$0xff] %v6181_v61  ;;  %7225 = vst [vmem:[#allocation20_spill] sm:$0xff] %v6183_v3  ;;  %v536_v4 = vsub.f32 %v6132_v12, %v535_v32  ;;  %v543_v28 = vsub.f32 %v6134_v18, %v542_v33  ;;  %v550_v46 = vsub.f32 %v6136_v19, %v549_v37 }
  0xcc   : > { %4648 = vmatpush3.bf16.msra.mxu0 %v6101_v56  ;;  %7226 = vst [vmem:[#allocation21_spill] sm:$0xff] %v6185_v5  ;;  %v4665_v7 = vpack.c.bf16 %v523_v47, %v516_v45  ;;  %v530_v8 = vand.u32 4294901760, %v529_v63  ;;  %v557_v36 = vsub.f32 %v6138_v25, %v556_v40  ;;  %v564_v29 = vsub.f32 %v6140_v26, %v563_v41 }
  0xcd   : > { %4650 = vmatprep.subr.bf16.mxu0 %v6118_v1  ;;  %v537_v9 = vand.u32 4294901760, %v536_v4  ;;  %v544_v23 = vand.u32 4294901760, %v543_v28  ;;  %v551_v24 = vand.u32 4294901760, %v550_v46  ;;  %v571_v45 = vsub.f32 %v6142_v27, %v570_v42 }
  0xce   : > { %v578_v33 = vsub.f32 %v6146_v55, %v577_v43  ;;  %v585_v37 = vsub.f32 %v6148_v14, %v584_v44  ;;  %v592_v46 = vsub.f32 %v6150_v15, %v591_v50  ;;  %v4689_v42 = vpack.c.bf16 %v6079_v35, %v6072_v30  ;;  %v1094_v44 = vld [vmem:[#allocation9] sm:$0xff]  ;;  %v1095_v50 = vld [vmem:[#allocation9 + $0x8] sm:$0xff]  ;;  %v6210_v30 = vld [vmem:[#allocation9 + $0x18] sm:$0xff] }
  0xcf   : > { %v4669_v22 = vpack.c.bf16 %v537_v9, %v530_v8  ;;  %v4673_v32 = vpack.c.bf16 %v551_v24, %v544_v23  ;;  %v572_v47 = vand.u32 4294901760, %v571_v45  ;;  %v4693_v43 = vpack.c.bf16 %v6093_v49, %v6091_v48  ;;  %v6215_v48 = vld [vmem:[#allocation9 + $0x28] sm:$0xff]  ;;  %v6230_v45 = vld [vmem:[#allocation9 + $0x30] sm:$0xff] }
  0xd0   : > { %4652 = vmatpush3.bf16.msra.mxu0 %v6118_v1  ;;  %v579_v9 = vand.u32 4294901760, %v578_v33  ;;  %v593_v63 = vand.u32 4294901760, %v592_v46  ;;  %v6207_v8 = vand.u32 4294901760, %v6059_v16  ;;  %v1111_v28 = vand.u32 4294901760, %v1094_v44  ;;  %v6232_v33 = vld [vmem:[#allocation9 + $0x38] sm:$0xff]  ;;  %v1103_v46 = vld [vmem:[#allocation9 + $0x48] sm:$0xff] }
  0xd1   : > { %4654 = vmatprep.subr.bf16.mxu0 %v6120_v2  ;;  %v4697_v49 = vpack.c.bf16 %v6108_v59, %v6106_v58  ;;  %v1120_v23 = vand.u32 4294901760, %v6210_v30  ;;  %v4713_v61 = vpack.c.bf16 %v6146_v55, %v6142_v27  ;;  %v7236_v55 = vand.u32 4294901760, %v6215_v48 }
  0xd2   : > { %v4681_v41 = vpack.c.bf16 %v579_v9, %v572_v47  ;;  %v6222_v24 = vsub.f32 %v6059_v16, %v6207_v8  ;;  %v4701_v16 = vpack.c.bf16 %v6132_v12, %v6129_v11  ;;  %v6247_v47 = vand.u32 4294901760, %v6061_v17  ;;  %v1102_v9 = vld [vmem:[#allocation9 + $0x40] sm:$0xff] }
  0xd3   : > { %v4705_v12 = vpack.c.bf16 %v6136_v19, %v6134_v18 }
  0xd4   : > { %4656 = vmatpush3.bf16.msra.mxu0 %v6120_v2  ;;  %7227 = vst [vmem:[#allocation22_spill] sm:$0xff] %v6222_v24  ;;  %v7172_v58 = vand.u32 4294901760, %v6222_v24  ;;  %v6262_v18 = vsub.f32 %v6061_v17, %v6247_v47 }
  0xd5   : > { %4658 = vmatprep.subr.bf16.mxu0 %v4657_v21 }
  0xd6   : > { %v1194_v11 = vsub.f32 %v6222_v24, %v7172_v58  ;;  %v1109_v58 = vld [vmem:[#allocation9 + $0x78] sm:$0xff]  ;;  %7232 = vst [vmem:[#allocation27_spill] sm:$0xff] %v6262_v18 }
  0xd7   : > { %3818 = vmatmul.mubr.f32.vlgmr.msra.gmra.mrb[0].mxu0 %v477_v6  ;;  %v565_v6 = vand.u32 4294901760, %v564_v29  ;;  %v1156_v17 = vand.u32 4294901760, %v1109_v58 }
  0xd8   : > { %4660 = vmatpush3.bf16.msra.mxu0 %v4657_v21  ;;  %3852 = vmatprep.mubr.f32.mxu0 %v6077_v34  ;;  %v558_v21 = vand.u32 4294901760, %v557_v36  ;;  %v1114_v36 = vand.u32 4294901760, %v1095_v50 }
  0xd9   : > { %4662 = vmatprep.subr.bf16.mxu0 %v4661_v62 }
  0xda   : > { %v4677_v40 = vpack.c.bf16 %v565_v6, %v558_v21  ;;  %v6224_v29 = vpack.c.bf16 %v1114_v36, %v1111_v28  ;;  %v6264_v19 = vsub.f32 %v1095_v50, %v1114_v36  ;;  %v4717_v50 = vpack.c.bf16 %v6150_v15, %v6148_v14 }
  0xdb   : > { %v6306_v14 = vsub.f32 %v6215_v48, %v7236_v55 }
  0xdc   : > { %4664 = vmatpush3.bf16.msra.mxu0 %v4661_v62  ;;  %v586_v62 = vand.u32 4294901760, %v585_v37  ;;  %7228 = vst [vmem:[#allocation23_spill] sm:$0xff] %v6224_v29  ;;  %4818 = vmatprep.subr.bf16.mxu1 %v6224_v29  ;;  %v1129_v37 = vand.u32 4294901760, %v6230_v45 }
  0xdd   : > { %4666 = vmatprep.subr.bf16.mxu0 %v4665_v7  ;;  %4820 = vmatpush3.bf16.msra.mxu1 %v6224_v29  ;;  %v1107_v29 = vld [vmem:[#allocation9 + $0x68] sm:$0xff] }
  0xde   : > { %v4685_v4 = vpack.c.bf16 %v593_v63, %v586_v62  ;;  %v1135_v63 = vand.u32 4294901760, %v1102_v9  ;;  %v6312_v60 = vsub.f32 %v6230_v45, %v1129_v37 }
  0xe0   : > { %4668 = vmatpush3.bf16.msra.mxu0 %v4665_v7  ;;  %v6204_v7 = vld [vmem:[#allocation9 + $0x10] sm:$0xff] }
  0xe1   : > { %4670 = vmatprep.subr.bf16.mxu0 %v4669_v22  ;;  %v1117_v35 = vand.u32 4294901760, %v6204_v7 }
  0xe3   : > { %v6228_v6 = vpack.c.bf16 %v1120_v23, %v1117_v35  ;;  %v6275_v36 = vsub.f32 %v6204_v7, %v1117_v35 }
  0xe4   : > { %4672 = vmatpush3.bf16.msra.mxu0 %v4669_v22  ;;  %v6213_v22 = vld [vmem:[#allocation9 + $0x20] sm:$0xff] }
  0xe5   : > { %4674 = vmatprep.subr.bf16.mxu0 %v4673_v32  ;;  %v1123_v21 = vand.u32 4294901760, %v6213_v22  ;;  %7229 = vst [vmem:[#allocation24_spill] sm:$0xff] %v6228_v6  ;;  %4822 = vmatprep.subr.bf16.mxu1 %v6228_v6  ;;  %v1228_v27 = vand.u32 4294901760, %v6275_v36 }
  0xe6   : > { %4824 = vmatpush3.bf16.msra.mxu1 %v6228_v6 }
  0xe8   : > { %4676 = vmatpush3.bf16.msra.mxu0 %v4673_v32  ;;  %v7167_v32 = vand.u32 4294901760, %v6215_v48 }
  0xe9   : > { %4678 = vmatprep.subr.bf16.mxu0 %v4677_v40 }
  0xea   : > { %v6242_v59 = vpack.c.bf16 %v7167_v32, %v1123_v21  ;;  %v1106_v32 = vld [vmem:[#allocation9 + $0x60] sm:$0xff] }
  0xeb   : > { %v1147_v3 = vand.u32 4294901760, %v1106_v32 }
  0xec   : > { %4680 = vmatpush3.bf16.msra.mxu0 %v4677_v40  ;;  %7230 = vst [vmem:[#allocation25_spill] sm:$0xff] %v6242_v59  ;;  %v1132_v40 = vand.u32 4294901760, %v6232_v33  ;;  %4826 = vmatprep.subr.bf16.mxu1 %v6242_v59 }
  0xed   : > { %4682 = vmatprep.subr.bf16.mxu0 %v4681_v41  ;;  %4828 = vmatpush3.bf16.msra.mxu1 %v6242_v59  ;;  %v6282_v59 = vsub.f32 %v6213_v22, %v1123_v21  ;;  %v6327_v57 = vsub.f32 %v1106_v32, %v1147_v3 }
  0xee   : > { %v6256_v62 = vpack.c.bf16 %v1132_v40, %v1129_v37  ;;  %v1229_v37 = vsub.f32 %v6275_v36, %v1228_v27 }
  0xf0   : > { %4684 = vmatpush3.bf16.msra.mxu0 %v4681_v41  ;;  %v1195_v41 = vand.u32 4294901760, %v1194_v11  ;;  %7231 = vst [vmem:[#allocation26_spill] sm:$0xff] %v6256_v62  ;;  %v4709_v11 = vpack.c.bf16 %v6140_v26, %v6138_v25  ;;  %4830 = vmatprep.subr.bf16.mxu1 %v6256_v62  ;;  %v1221_v25 = vand.u32 4294901760, %v6264_v19  ;;  %v6279_v26 = vsub.f32 %v6210_v30, %v1120_v23 }
  0xf1   : > { %4686 = vmatprep.subr.bf16.mxu0 %v4685_v4  ;;  %4832 = vmatpush3.bf16.msra.mxu1 %v6256_v62  ;;  %v7235_v23 = vand.u32 4294901760, %v6262_v18  ;;  %v1242_v62 = vand.u32 4294901760, %v6282_v59 }
  0xf2   : > { %4027 = vmatprep.mubr.f32.mxu1 %v1195_v41  ;;  %v1222_v15 = vsub.f32 %v6264_v19, %v1221_v25 }
  0xf3   : > { %v6300_v21 = vsub.f32 %v6262_v18, %v7235_v23  ;;  %v6316_v23 = vsub.f32 %v6232_v33, %v1132_v40  ;;  %v6318_v18 = vsub.f32 %v1102_v9, %v1135_v63  ;;  %v6335_v40 = vsub.f32 %v1109_v58, %v1156_v17 }
  0xf4   : > { %4688 = vmatpush3.bf16.msra.mxu0 %v4685_v4  ;;  %v1138_v4 = vand.u32 4294901760, %v1103_v46 }
  0xf5   : > { %4690 = vmatprep.subr.bf16.mxu0 %v4689_v42  ;;  %v1270_v32 = vand.u32 4294901760, %v6318_v18 }
  0xf6   : > { %v6320_v48 = vsub.f32 %v1103_v46, %v1138_v4  ;;  %v1223_v46 = vand.u32 4294901760, %v1222_v15 }
  0xf7   : > { %3853 = vmatmul.mubr.f32.vlgmr.msra.gmra.mrb[0].mxu0 %v6095_v51  ;;  %v1108_v51 = vld [vmem:[#allocation9 + $0x70] sm:$0xff] }
  0xf8   : > { %4692 = vmatpush3.bf16.msra.mxu0 %v4689_v42  ;;  %3887 = vmatprep.mubr.f32.mxu0 %v6082_v38  ;;  %v1104_v42 = vld [vmem:[#allocation9 + $0x50] sm:$0xff]  ;;  %v1153_v41 = vand.u32 4294901760, %v1108_v51 }
  0xf9   : > { %4694 = vmatprep.subr.bf16.mxu0 %v4693_v43  ;;  %v1141_v6 = vand.u32 4294901760, %v1104_v42 }
  0xfa   : > { %v6294_v30 = vpack.c.bf16 %v1156_v17, %v1153_v41  ;;  %v6333_v33 = vsub.f32 %v1108_v51, %v1153_v41  ;;  %v1277_v51 = vand.u32 4294901760, %v6320_v48 }
  0xfc   : > { %4696 = vmatpush3.bf16.msra.mxu0 %v4693_v43  ;;  %v1105_v43 = vld [vmem:[#allocation9 + $0x58] sm:$0xff] }
  0xfd   : > { %4698 = vmatprep.subr.bf16.mxu0 %v4697_v49  ;;  %v1144_v5 = vand.u32 4294901760, %v1105_v43 }
  0xff   : > { %v6290_v7 = vpack.c.bf16 %v1144_v5, %v1141_v6  ;;  %v6325_v55 = vsub.f32 %v1105_v43, %v1144_v5  ;;  %v1243_v5 = vsub.f32 %v6282_v59, %v1242_v62 }
 0x100   : > { %4700 = vmatpush3.bf16.msra.mxu0 %v4697_v49  ;;  %v6258_v49 = vsub.f32 %v1094_v44, %v1111_v28  ;;  %v6270_v44 = vpack.c.bf16 %v1138_v4, %v1135_v63  ;;  %v1150_v28 = vand.u32 4294901760, %v1107_v29  ;;  %v1298_v63 = vand.u32 4294901760, %v6327_v57 }
 0x101   : > { %4702 = vmatprep.subr.bf16.mxu0 %v4701_v16  ;;  %7234 = vst [vmem:[#allocation29_spill] sm:$0xff] %v6290_v7  ;;  %v1291_v58 = vand.u32 4294901760, %v6325_v55 }
 0x102   : > { %7233 = vst [vmem:[#allocation28_spill] sm:$0xff] %v6270_v44  ;;  %4834 = vmatprep.subr.bf16.mxu1 %v6270_v44  ;;  %v6292_v35 = vpack.c.bf16 %v1150_v28, %v1147_v3  ;;  %v6329_v45 = vsub.f32 %v1107_v29, %v1150_v28  ;;  %v1256_v3 = vand.u32 4294901760, %v6312_v60  ;;  %v1263_v29 = vand.u32 4294901760, %v6316_v23 }
 0x103   : > { %4836 = vmatpush3.bf16.msra.mxu1 %v6270_v44  ;;  %v1249_v44 = vand.u32 4294901760, %v6306_v14 }
 0x104   : > { %4704 = vmatpush3.bf16.msra.mxu0 %v4701_v16  ;;  %v1214_v16 = vand.u32 4294901760, %v6258_v49  ;;  %4838 = vmatprep.subr.bf16.mxu1 %v6290_v7  ;;  %v1305_v4 = vand.u32 4294901760, %v6329_v45  ;;  %v6358_v15 = vpack.c.bf16 %v1263_v29, %v1256_v3 }
 0x105   : > { %4706 = vmatprep.subr.bf16.mxu0 %v4705_v12  ;;  %v1250_v17 = vsub.f32 %v6306_v14, %v1249_v44 }
 0x106   : > { %v1215_v22 = vsub.f32 %v6258_v49, %v1214_v16  ;;  %v6351_v28 = vpack.c.bf16 %v1221_v25, %v1214_v16  ;;  %v6366_v43 = vpack.c.bf16 %v1305_v4, %v1298_v63  ;;  %v7238_v16 = vand.u32 4294901760, %v6335_v40 }
 0x107   : > { %4840 = vmatpush3.bf16.msra.mxu1 %v6290_v7  ;;  %v6360_v7 = vpack.c.bf16 %v1277_v51, %v1270_v32 }
 0x108   : > { %4708 = vmatpush3.bf16.msra.mxu0 %v4705_v12  ;;  %v1235_v12 = vand.u32 4294901760, %v6279_v26  ;;  %v1216_v9 = vand.u32 4294901760, %v1215_v22  ;;  %4842 = vmatprep.subr.bf16.mxu1 %v6292_v35  ;;  %v6356_v22 = vpack.c.bf16 %v1249_v44, %v1242_v62  ;;  %7237 = vst [vmem:[#allocation30_spill] sm:$0xff] %v6366_v43  ;;  %v1230_v44 = vand.u32 4294901760, %v1229_v37 }
 0x109   : > { %4710 = vmatprep.subr.bf16.mxu0 %v4709_v11  ;;  %v1257_v37 = vsub.f32 %v6312_v60, %v1256_v3 }
 0x10a   : > { %v6353_v41 = vpack.c.bf16 %v1235_v12, %v1228_v27  ;;  %v4849_v62 = vpack.c.bf16 %v1223_v46, %v1216_v9  ;;  %v7240_v27 = vand.u32 4294901760, %v6082_v38  ;;  %v1264_v9 = vsub.f32 %v6316_v23, %v1263_v29 }
 0x10b   : > { %4844 = vmatpush3.bf16.msra.mxu1 %v6292_v35 }
 0x10c   : > { %4712 = vmatpush3.bf16.msra.mxu0 %v4709_v11  ;;  %v6323_v11 = vsub.f32 %v1104_v42, %v1141_v6  ;;  %v1236_v6 = vsub.f32 %v6279_v26, %v1235_v12  ;;  %v1312_v42 = vand.u32 4294901760, %v6333_v33  ;;  %4846 = vmatprep.subr.bf16.mxu1 %v6294_v30  ;;  %v1205_v12 = vand.u32 4294901760, %v6300_v21 }
 0x10d   : > { %4714 = vmatprep.subr.bf16.mxu0 %v4713_v61  ;;  %v1258_v21 = vand.u32 4294901760, %v1257_v37  ;;  %v1265_v46 = vand.u32 4294901760, %v1264_v9 }
 0x10e   : > { %v6370_v25 = vpack.c.bf16 %v7238_v16, %v1312_v42  ;;  %v1244_v16 = vand.u32 4294901760, %v1243_v5  ;;  %v1278_v5 = vsub.f32 %v6320_v48, %v1277_v51 }
 0x10f   : > { %4848 = vmatpush3.bf16.msra.mxu1 %v6294_v30  ;;  %v4861_v29 = vpack.c.bf16 %v1265_v46, %v1258_v21  ;;  %v7242_v21 = vand.u32 4294901760, %v6115_v0  ;;  %v4885_v46 = vpack.c.bf16 %v6279_v26, %v6275_v36  ;;  %v7246_v36 = vld [vmem:[#allocation19_spill] sm:$0xff]  ;;  %v4905_v26 = vpack.c.bf16 %v6329_v45, %v6327_v57 }
 0x110   : > { %4716 = vmatpush3.bf16.msra.mxu0 %v4713_v61  ;;  %v1284_v61 = vand.u32 4294901760, %v6323_v11  ;;  %7239 = vst [vmem:[#allocation31_spill] sm:$0xff] %v6370_v25  ;;  %v1251_v25 = vand.u32 4294901760, %v1250_v17  ;;  %4850 = vmatprep.subr.bf16.mxu1 %v4849_v62 }
 0x111   : > { %4718 = vmatprep.subr.bf16.mxu0 %v4717_v50 }
 0x112   : > { %v6364_v24 = vpack.c.bf16 %v1291_v58, %v1284_v61  ;;  %4028 = vmatmul.mubr.f32.vlgmr.msra.gmra.mrb[0].mxu1 %v1205_v12  ;;  %v4857_v38 = vpack.c.bf16 %v1251_v25, %v1244_v16  ;;  %v1285_v3 = vsub.f32 %v6323_v11, %v1284_v61  ;;  %v1279_v25 = vand.u32 4294901760, %v1278_v5  ;;  %v1085_v5 = vld [vmem:[#allocation7 + $0x38] sm:$0xff] }
 0x113   : > { %4852 = vmatpush3.bf16.msra.mxu1 %v4849_v62  ;;  %4062 = vmatprep.mubr.f32.mxu1 %v6207_v8  ;;  %v1292_v62 = vsub.f32 %v6325_v55, %v1291_v58  ;;  %v1313_v61 = vsub.f32 %v6333_v33, %v1312_v42  ;;  %v7241_v16 = vand.u32 4294901760, %v6335_v40 }
 0x114   : > { %4720 = vmatpush3.bf16.msra.mxu0 %v4717_v50  ;;  %v1237_v50 = vand.u32 4294901760, %v1236_v6  ;;  %v1271_v6 = vsub.f32 %v6318_v18, %v1270_v32  ;;  %v1286_v32 = vand.u32 4294901760, %v1285_v3 }
 0x115   : > { %4722 = vmatprep.subr.bf16.mxu0 %v6050_v10  ;;  %v1320_v37 = vsub.f32 %v6335_v40, %v7241_v16  ;;  %v6555_v16 = vld [vmem:[#allocation7 + $0x68] sm:$0xff] }
 0x116   : > { %v4853_v43 = vpack.c.bf16 %v1237_v50, %v1230_v44  ;;  %v1272_v17 = vand.u32 4294901760, %v1271_v6  ;;  %v1293_v44 = vand.u32 4294901760, %v1292_v62  ;;  %v1299_v50 = vsub.f32 %v6327_v57, %v1298_v63  ;;  %v7250_v57 = vld [vmem:[#allocation23_spill] sm:$0xff]  ;;  %v1084_v6 = vld [vmem:[#allocation7 + $0x30] sm:$0xff]  ;;  %v6535_v62 = vld [vmem:[#allocation7 + $0x48] sm:$0xff] }
 0x117   : > { %3888 = vmatmul.mubr.f32.vlgmr.msra.gmra.mrb[0].mxu0 %v6115_v0  ;;  %v1321_v9 = vand.u32 4294901760, %v1320_v37  ;;  %v4889_v0 = vpack.c.bf16 %v6306_v14, %v6282_v59  ;;  %v4897_v59 = vpack.c.bf16 %v6320_v48, %v6318_v18  ;;  %v7248_v18 = vld [vmem:[#allocation21_spill] sm:$0xff]  ;;  %v4909_v14 = vpack.c.bf16 %v6335_v40, %v6333_v33  ;;  %v7251_v48 = vld [vmem:[#allocation27_spill] sm:$0xff] }
 0x118   : > { %4724 = vmatpush3.bf16.msra.mxu0 %v6050_v10  ;;  %3922 = vmatprep.mubr.f32.mxu0 %v7240_v27  ;;  %v4865_v51 = vpack.c.bf16 %v1279_v25, %v1272_v17  ;;  %v4869_v58 = vpack.c.bf16 %v1293_v44, %v1286_v32  ;;  %v1300_v27 = vand.u32 4294901760, %v1299_v50  ;;  %v1081_v33 = vld [vmem:[#allocation7 + $0x18] sm:$0xff]  ;;  %v1813_v3 = vand.u32 4294901760, %v1084_v6  ;;  %v6533_v25 = vld [vmem:[#allocation7 + $0x40] sm:$0xff]  ;;  %v6543_v50 = vld [vmem:[#allocation7 + $0x50] sm:$0xff] }
 0x119   : > { %4726 = vmatprep.subr.bf16.mxu0 %v6052_v13  ;;  %4854 = vmatprep.subr.bf16.mxu1 %v4853_v43  ;;  %v1819_v32 = vand.u32 4294901760, %v6533_v25 }
 0x11a   : > { %4856 = vmatpush3.bf16.msra.mxu1 %v4853_v43  ;;  %v1306_v43 = vsub.f32 %v6329_v45, %v1305_v4  ;;  %v1314_v4 = vand.u32 4294901760, %v1313_v61  ;;  %v1080_v45 = vld [vmem:[#allocation7 + $0x10] sm:$0xff]  ;;  %v1825_v61 = vand.u32 4294901760, %v6543_v50 }
 0x11b   : > { %4858 = vmatprep.subr.bf16.mxu1 %v4857_v38  ;;  %v1801_v40 = vand.u32 4294901760, %v1080_v45 }
 0x11c   : > { %4728 = vmatpush3.bf16.msra.mxu0 %v6052_v13  ;;  %v1307_v12 = vand.u32 4294901760, %v1306_v43  ;;  %v4877_v42 = vpack.c.bf16 %v1321_v9, %v1314_v4  ;;  %v6545_v43 = vld [vmem:[#allocation7 + $0x58] sm:$0xff] }
 0x11d   : > { %4730 = vmatprep.subr.bf16.mxu0 %v6065_v20 }
 0x11e   : > { %4860 = vmatpush3.bf16.msra.mxu1 %v4857_v38  ;;  %v4873_v63 = vpack.c.bf16 %v1307_v12, %v1300_v27  ;;  %v4881_v38 = vpack.c.bf16 %v6264_v19, %v6258_v49  ;;  %v7244_v49 = vld [vmem:[#allocation17_spill] sm:$0xff]  ;;  %v7245_v19 = vld [vmem:[#allocation18_spill] sm:$0xff]  ;;  %v6553_v12 = vld [vmem:[#allocation7 + $0x60] sm:$0xff] }
 0x11f   : > { %4862 = vmatprep.subr.bf16.mxu1 %v4861_v29  ;;  %v1831_v37 = vand.u32 4294901760, %v6553_v12 }
 0x120   : > { %4732 = vmatpush3.bf16.msra.mxu0 %v6065_v20 }
 0x121   : > { %4734 = vmatprep.subr.bf16.mxu0 %v6075_v31 }
 0x122   : > { %4864 = vmatpush3.bf16.msra.mxu1 %v4861_v29  ;;  %v1816_v29 = vand.u32 4294901760, %v1085_v5 }
 0x123   : > { %4866 = vmatprep.subr.bf16.mxu1 %v4865_v51 }
 0x124   : > { %4736 = vmatpush3.bf16.msra.mxu0 %v6075_v31  ;;  %v6531_v17 = vpack.c.bf16 %v1816_v29, %v1813_v3 }
 0x125   : > { %4738 = vmatprep.subr.bf16.mxu0 %v6085_v39 }
 0x126   : > { %4868 = vmatpush3.bf16.msra.mxu1 %v4865_v51  ;;  %v1822_v51 = vand.u32 4294901760, %v6535_v62 }
 0x127   : > { %4870 = vmatprep.subr.bf16.mxu1 %v4869_v58 }
 0x128   : > { %4740 = vmatpush3.bf16.msra.mxu0 %v6085_v39  ;;  %v6541_v44 = vpack.c.bf16 %v1822_v51, %v1819_v32 }
 0x129   : > { %4742 = vmatprep.subr.bf16.mxu0 %v6101_v56 }
 0x12a   : > { %4872 = vmatpush3.bf16.msra.mxu1 %v4869_v58  ;;  %v1828_v58 = vand.u32 4294901760, %v6545_v43 }
 0x12b   : > { %4874 = vmatprep.subr.bf16.mxu1 %v4873_v63 }
 0x12c   : > { %4744 = vmatpush3.bf16.msra.mxu0 %v6101_v56  ;;  %v6551_v27 = vpack.c.bf16 %v1828_v58, %v1825_v61 }
 0x12d   : > { %4746 = vmatprep.subr.bf16.mxu0 %v6118_v1 }
 0x12e   : > { %4876 = vmatpush3.bf16.msra.mxu1 %v4873_v63  ;;  %v1834_v63 = vand.u32 4294901760, %v6555_v16 }
 0x12f   : > { %4878 = vmatprep.subr.bf16.mxu1 %v4877_v42 }
 0x130   : > { %4748 = vmatpush3.bf16.msra.mxu0 %v6118_v1  ;;  %v6565_v4 = vpack.c.bf16 %v1834_v63, %v1831_v37 }
 0x131   : > { %4750 = vmatprep.subr.bf16.mxu0 %v6120_v2 }
 0x132   : > { %4880 = vmatpush3.bf16.msra.mxu1 %v4877_v42 }
 0x133   : > { %4882 = vmatprep.subr.bf16.mxu1 %v4881_v38 }
 0x134   : > { %4752 = vmatpush3.bf16.msra.mxu0 %v6120_v2 }
 0x135   : > { %4754 = vmatprep.subr.bf16.mxu0 %v6170_v52  ;;  %4063 = vmatmul.mubr.f32.vlgmr.msra.gmra.mrb[0].mxu1 %v6247_v47 }
 0x136   : > { %4884 = vmatpush3.bf16.msra.mxu1 %v4881_v38  ;;  %v6571_v38 = vld [vmem:[#allocation7 + $0x70] sm:$0xff] }
 0x137   : > { %3923 = vmatmul.mubr.f32.vlgmr.msra.gmra.mrb[0].mxu0 %v7242_v21  ;;  %4886 = vmatprep.subr.bf16.mxu1 %v4885_v46  ;;  %v6573_v21 = vld [vmem:[#allocation7 + $0x78] sm:$0xff] }
 0x138   : > { %4756 = vmatpush3.bf16.msra.mxu0 %v6170_v52  ;;  %3957 = vmatprep.mubr.f32.mxu0 %v6077_v34  ;;  %v7243_v52 = vld [vmem:[#allocation22_spill] sm:$0xff] }
 0x139   : > { %4758 = vmatprep.subr.bf16.mxu0 %v6173_v53  ;;  %4097 = vmatprep.mubr.f32.mxu1 %v7243_v52 }
 0x13a   : > { %4888 = vmatpush3.bf16.msra.mxu1 %v4885_v46  ;;  %v1837_v46 = vand.u32 4294901760, %v6571_v38 }
 0x13b   : > { %4890 = vmatprep.subr.bf16.mxu1 %v4889_v0 }
 0x13c   : > { %4760 = vmatpush3.bf16.msra.mxu0 %v6173_v53  ;;  %v4893_v53 = vpack.c.bf16 %v6316_v23, %v6312_v60  ;;  %v7247_v60 = vld [vmem:[#allocation20_spill] sm:$0xff] }
 0x13d   : > { %4762 = vmatprep.subr.bf16.mxu0 %v6175_v54  ;;  %v7249_v23 = vld [vmem:[#allocation16_spill] sm:$0xff] }
 0x13e   : > { %4892 = vmatpush3.bf16.msra.mxu1 %v4889_v0  ;;  %v1840_v0 = vand.u32 4294901760, %v6573_v21 }
 0x13f   : > { %4894 = vmatprep.subr.bf16.mxu1 %v4893_v53 }
 0x140   : > { %4764 = vmatpush3.bf16.msra.mxu0 %v6175_v54  ;;  %v4901_v54 = vpack.c.bf16 %v6325_v55, %v6323_v11  ;;  %v7252_v11 = vld [vmem:[#allocation24_spill] sm:$0xff]  ;;  %v7253_v55 = vand.u32 4294901760, %v7243_v52 }
 0x141   : > { %4766 = vmatprep.subr.bf16.mxu0 %v7244_v49 }
 0x142   : > { %4896 = vmatpush3.bf16.msra.mxu1 %v4893_v53  ;;  %v6585_v53 = vpack.c.bf16 %v1840_v0, %v1837_v46 }
 0x143   : > { %4898 = vmatprep.subr.bf16.mxu1 %v4897_v59 }
 0x144   : > { %4768 = vmatpush3.bf16.msra.mxu0 %v7244_v49 }
 0x145   : > { %4770 = vmatprep.subr.bf16.mxu0 %v7245_v19 }
 0x146   : > { %4900 = vmatpush3.bf16.msra.mxu1 %v4897_v59 }
 0x147   : > { %4902 = vmatprep.subr.bf16.mxu1 %v4901_v54 }
 0x148   : > { %4772 = vmatpush3.bf16.msra.mxu0 %v7245_v19 }
 0x149   : > { %4774 = vmatprep.subr.bf16.mxu0 %v7246_v36 }
 0x14a   : > { %4904 = vmatpush3.bf16.msra.mxu1 %v4901_v54 }
 0x14b   : > { %4906 = vmatprep.subr.bf16.mxu1 %v4905_v26 }
 0x14c   : > { %4776 = vmatpush3.bf16.msra.mxu0 %v7246_v36  ;;  %v6593_v36 = vsub.f32 %v1080_v45, %v1801_v40 }
 0x14d   : > { %4778 = vmatprep.subr.bf16.mxu0 %v7247_v60 }
 0x14e   : > { %4908 = vmatpush3.bf16.msra.mxu1 %v4905_v26 }
 0x14f   : > { %4910 = vmatprep.subr.bf16.mxu1 %v4909_v14 }
 0x150   : > { %4780 = vmatpush3.bf16.msra.mxu0 %v7247_v60 }
 0x151   : > { %4782 = vmatprep.subr.bf16.mxu0 %v7248_v18 }
 0x152   : > { %4912 = vmatpush3.bf16.msra.mxu1 %v4909_v14 }
 0x153   : > { %4914 = vmatprep.subr.bf16.mxu1 %v7250_v57 }
 0x154   : > { %4784 = vmatpush3.bf16.msra.mxu0 %v7248_v18  ;;  %v1912_v18 = vand.u32 4294901760, %v6593_v36 }
 0x155   : > { %4786 = vmatprep.subr.bf16.mxu0 %v6050_v10  ;;  %4098 = vmatmul.mubr.f32.vlgmr.msra.gmra.mrb[0].mxu1 %v7251_v48 }
 0x156   : > { %4916 = vmatpush3.bf16.msra.mxu1 %v7250_v57  ;;  %4132 = vmatprep.mubr.f32.mxu1 %v7253_v55 }
 0x157   : > { %3958 = vmatmul.mubr.f32.vlgmr.msra.gmra.mrb[0].mxu0 %v7249_v23  ;;  %4918 = vmatprep.subr.bf16.mxu1 %v7252_v11 }
 0x158   : > { %4788 = vmatpush3.bf16.msra.mxu0 %v6050_v10  ;;  %3992 = vmatprep.mubr.f32.mxu0 %v6077_v34  ;;  %v7254_v10 = vld [vmem:[#allocation25_spill] sm:$0xff]  ;;  %v7258_v34 = vand.u32 4294901760, %v7251_v48 }
 0x159   : > { %4790 = vmatprep.subr.bf16.mxu0 %v6052_v13 }
 0x15a   : > { %4920 = vmatpush3.bf16.msra.mxu1 %v7252_v11 }
 0x15b   : > { %4922 = vmatprep.subr.bf16.mxu1 %v7254_v10 }
 0x15c   : > { %4792 = vmatpush3.bf16.msra.mxu0 %v6052_v13  ;;  %v7255_v13 = vld [vmem:[#allocation26_spill] sm:$0xff] }
 0x15d   : > { %4794 = vmatprep.subr.bf16.mxu0 %v6065_v20 }
 0x15e   : > { %4924 = vmatpush3.bf16.msra.mxu1 %v7254_v10 }
 0x15f   : > { %4926 = vmatprep.subr.bf16.mxu1 %v7255_v13 }
 0x160   : > { %4796 = vmatpush3.bf16.msra.mxu0 %v6065_v20  ;;  %v7256_v20 = vld [vmem:[#allocation28_spill] sm:$0xff] }
 0x161   : > { %4798 = vmatprep.subr.bf16.mxu0 %v6075_v31 }
 0x162   : > { %4928 = vmatpush3.bf16.msra.mxu1 %v7255_v13 }
 0x163   : > { %4930 = vmatprep.subr.bf16.mxu1 %v7256_v20 }
 0x164   : > { %4800 = vmatpush3.bf16.msra.mxu0 %v6075_v31  ;;  %v7257_v31 = vld [vmem:[#allocation29_spill] sm:$0xff] }
 0x165   : > { %4802 = vmatprep.subr.bf16.mxu0 %v6085_v39 }
 0x166   : > { %4932 = vmatpush3.bf16.msra.mxu1 %v7256_v20 }
 0x167   : > { %4934 = vmatprep.subr.bf16.mxu1 %v7257_v31 }
 0x168   : > { %4804 = vmatpush3.bf16.msra.mxu0 %v6085_v39  ;;  %v7259_v39 = vld [vmem:[#allocation30_spill] sm:$0xff] }
 0x169   : > { %4806 = vmatprep.subr.bf16.mxu0 %v6101_v56 }
 0x16a   : > { %4936 = vmatpush3.bf16.msra.mxu1 %v7257_v31 }
 0x16b   : > { %4938 = vmatprep.subr.bf16.mxu1 %v6292_v35 }
 0x16c   : > { %4808 = vmatpush3.bf16.msra.mxu0 %v6101_v56  ;;  %v7260_v56 = vld [vmem:[#allocation31_spill] sm:$0xff] }
 0x16d   : > { %4810 = vmatprep.subr.bf16.mxu0 %v6118_v1 }
 0x16e   : > { %4940 = vmatpush3.bf16.msra.mxu1 %v6292_v35 }
 0x16f   : > { %4942 = vmatprep.subr.bf16.mxu1 %v6294_v30 }
 0x170   : > { %4812 = vmatpush3.bf16.msra.mxu0 %v6118_v1  ;;  %v1078_v1 = vld [vmem:[#allocation7] sm:$0xff] }
 0x171   : > { %4814 = vmatprep.subr.bf16.mxu0 %v6120_v2 }
 0x172   : > { %4944 = vmatpush3.bf16.msra.mxu1 %v6294_v30 }
 0x173   : > { %4946 = vmatprep.subr.bf16.mxu1 %v6351_v28 }
 0x174   : > { %4816 = vmatpush3.bf16.msra.mxu0 %v6120_v2  ;;  %v1079_v2 = vld [vmem:[#allocation7 + $0x8] sm:$0xff] }
 0x175   : > { %4133 = vmatmul.mubr.f32.vlgmr.msra.gmra.mrb[0].mxu1 %v7258_v34 }
 0x176   : > { %4948 = vmatpush3.bf16.msra.mxu1 %v6351_v28  ;;  %4167 = vmatprep.mubr.f32.mxu1 %v6207_v8  ;;  %v1804_v28 = vand.u32 4294901760, %v1081_v33 }
 0x177   : > { %3993 = vmatmul.mubr.f32.vlgmr.msra.gmra.mrb[0].mxu0 %v7249_v23  ;;  %4950 = vmatprep.subr.bf16.mxu1 %v6353_v41 }
 0x178   : > { %v6595_v54 = vsub.f32 %v1081_v33, %v1804_v28 }
 0x17a   : > { %4952 = vmatpush3.bf16.msra.mxu1 %v6353_v41  ;;  %v1082_v41 = vld [vmem:[#allocation7 + $0x20] sm:$0xff]  ;;  %v1919_v14 = vand.u32 4294901760, %v6595_v54 }
 0x17b   : > { %4954 = vmatprep.subr.bf16.mxu1 %v6356_v22 }
 0x17c   : > { %v1920_v48 = vsub.f32 %v6595_v54, %v1919_v14 }
 0x17e   : > { %4956 = vmatpush3.bf16.msra.mxu1 %v6356_v22 }
 0x17f   : > { %4958 = vmatprep.subr.bf16.mxu1 %v6358_v15 }
 0x182   : > { %4960 = vmatpush3.bf16.msra.mxu1 %v6358_v15 }
 0x183   : > { %4962 = vmatprep.subr.bf16.mxu1 %v6360_v7 }
 0x186   : > { %4964 = vmatpush3.bf16.msra.mxu1 %v6360_v7 }
 0x187   : > { %4966 = vmatprep.subr.bf16.mxu1 %v6364_v24 }
 0x18a   : > { %4968 = vmatpush3.bf16.msra.mxu1 %v6364_v24  ;;  %v1798_v24 = vand.u32 4294901760, %v1079_v2 }
 0x18b   : > { %4970 = vmatprep.subr.bf16.mxu1 %v7259_v39 }
 0x18c   : > { %v6569_v42 = vsub.f32 %v1079_v2, %v1798_v24  ;;  %v6626_v2 = vsub.f32 %v1085_v5, %v1816_v29 }
 0x18e   : > { %4972 = vmatpush3.bf16.msra.mxu1 %v7259_v39  ;;  %v1905_v49 = vand.u32 4294901760, %v6569_v42  ;;  %v7202_v33 = vand.u32 4294901760, %v6626_v2 }
 0x18f   : > { %4974 = vmatprep.subr.bf16.mxu1 %v7260_v56 }
 0x190   : > { %v1906_v59 = vsub.f32 %v6569_v42, %v1905_v49 }
 0x192   : > { %4976 = vmatpush3.bf16.msra.mxu1 %v7260_v56  ;;  %v1907_v26 = vand.u32 4294901760, %v1906_v59 }
 0x193   : > { %4978 = vmatprep.subr.bf16.mxu1 %v7250_v57 }
 0x195   : > { %4168 = vmatmul.mubr.f32.vlgmr.msra.gmra.mrb[0].mxu1 %v6247_v47 }
 0x196   : > { %4980 = vmatpush3.bf16.msra.mxu1 %v7250_v57  ;;  %4202 = vmatprep.mubr.f32.mxu1 %v6207_v8  ;;  %v1795_v8 = vand.u32 4294901760, %v1078_v1  ;;  %v1913_v57 = vsub.f32 %v6593_v36, %v1912_v18 }
 0x197   : > { %4982 = vmatprep.subr.bf16.mxu1 %v7252_v11 }
 0x198   : > { %v6519_v7 = vpack.c.bf16 %v1798_v24, %v1795_v8  ;;  %v6567_v9 = vsub.f32 %v1078_v1, %v1795_v8  ;;  %v6624_v1 = vsub.f32 %v1084_v6, %v1813_v3 }
 0x19a   : > { %4984 = vmatpush3.bf16.msra.mxu1 %v7252_v11  ;;  %v1898_v52 = vand.u32 4294901760, %v6567_v9  ;;  %v1940_v45 = vand.u32 4294901760, %v6624_v1 }
 0x19b   : > { %4986 = vmatprep.subr.bf16.mxu1 %v7254_v10 }
 0x19c   : > { %v1899_v19 = vsub.f32 %v6567_v9, %v1898_v52 }
 0x19e   : > { %4988 = vmatpush3.bf16.msra.mxu1 %v7254_v10  ;;  %v1900_v60 = vand.u32 4294901760, %v1899_v19  ;;  %v1914_v10 = vand.u32 4294901760, %v1913_v57 }
 0x19f   : > { %4990 = vmatprep.subr.bf16.mxu1 %v7255_v13 }
 0x1a0   : > { %v6601_v23 = vpack.c.bf16 %v1907_v26, %v1900_v60 }
 0x1a2   : > { %4992 = vmatpush3.bf16.msra.mxu1 %v7255_v13  ;;  %v1921_v13 = vand.u32 4294901760, %v1920_v48 }
 0x1a3   : > { %4994 = vmatprep.subr.bf16.mxu1 %v7256_v20 }
 0x1a4   : > { %v6616_v34 = vpack.c.bf16 %v1921_v13, %v1914_v10 }
 0x1a6   : > { %4996 = vmatpush3.bf16.msra.mxu1 %v7256_v20 }
 0x1a7   : > { %4998 = vmatprep.subr.bf16.mxu1 %v7257_v31 }
 0x1aa   : > { %5000 = vmatpush3.bf16.msra.mxu1 %v7257_v31 }
 0x1ab   : > { %5002 = vmatprep.subr.bf16.mxu1 %v6292_v35 }
 0x1ae   : > { %5004 = vmatpush3.bf16.msra.mxu1 %v6292_v35  ;;  %v6523_v35 = vpack.c.bf16 %v1804_v28, %v1801_v40  ;;  %v1941_v28 = vsub.f32 %v6624_v1, %v1940_v45 }
 0x1af   : > { %5006 = vmatprep.subr.bf16.mxu1 %v6294_v30 }
 0x1b2   : > { %5008 = vmatpush3.bf16.msra.mxu1 %v6294_v30  ;;  %v1083_v30 = vld [vmem:[#allocation7 + $0x28] sm:$0xff] }
 0x1b3   : > { %5010 = vmatprep.subr.bf16.mxu1 %v6519_v7  ;;  %v1810_v22 = vand.u32 4294901760, %v1083_v30 }
 0x1b5   : > { %4203 = vmatmul.mubr.f32.vlgmr.msra.gmra.mrb[0].mxu1 %v6247_v47  ;;  %v1807_v47 = vand.u32 4294901760, %v1082_v41  ;;  %v6611_v55 = vsub.f32 %v1083_v30, %v1810_v22  ;;  %v6639_v30 = vsub.f32 %v6535_v62, %v1822_v51  ;;  %v6653_v62 = vsub.f32 %v6543_v50, %v1825_v61 }
 0x1b6   : > { %5012 = vmatpush3.bf16.msra.mxu1 %v6519_v7  ;;  %v6678_v61 = vsub.f32 %v6555_v16, %v1834_v63  ;;  %v6695_v16 = vsub.f32 %v6573_v21, %v1840_v0 }
 0x1b7   : > { %5014 = vmatprep.subr.bf16.mxu1 %v6523_v35  ;;  %v6527_v15 = vpack.c.bf16 %v1810_v22, %v1807_v47  ;;  %v6609_v11 = vsub.f32 %v1082_v41, %v1807_v47  ;;  %v1933_v31 = vand.u32 4294901760, %v6611_v55  ;;  %v6636_v41 = vsub.f32 %v6533_v25, %v1819_v32 }
 0x1b8   : > { %v1948_v47 = vsub.f32 %v6626_v2, %v7202_v33  ;;  %v1942_v22 = vand.u32 4294901760, %v1941_v28  ;;  %v7200_v5 = vand.u32 4294901760, %v6639_v30  ;;  %v6656_v32 = vsub.f32 %v6545_v43, %v1828_v58 }
 0x1b9   : > { %v1926_v20 = vand.u32 4294901760, %v6609_v11  ;;  %v1934_v56 = vsub.f32 %v6611_v55, %v1933_v31  ;;  %v7201_v6 = vand.u32 4294901760, %v6636_v41  ;;  %v7199_v60 = vand.u32 4294901760, %v6653_v62 }
 0x1ba   : > { %5016 = vmatpush3.bf16.msra.mxu1 %v6523_v35  ;;  %v1949_v3 = vand.u32 4294901760, %v1948_v47  ;;  %v1962_v25 = vsub.f32 %v6639_v30, %v7200_v5  ;;  %v7198_v26 = vand.u32 4294901760, %v6656_v32  ;;  %v6673_v43 = vsub.f32 %v6553_v12, %v1831_v37 }
 0x1bb   : > { %5018 = vmatprep.subr.bf16.mxu1 %v6527_v15  ;;  %v1927_v39 = vsub.f32 %v6609_v11, %v1926_v20  ;;  %v1935_v24 = vand.u32 4294901760, %v1934_v56  ;;  %v1955_v29 = vsub.f32 %v6636_v41, %v7201_v6  ;;  %v1969_v48 = vsub.f32 %v6653_v62, %v7199_v60 }
 0x1bc   : > { %v6658_v51 = vpack.c.bf16 %v1949_v3, %v1942_v22  ;;  %v1963_v59 = vand.u32 4294901760, %v1962_v25  ;;  %v1976_v50 = vsub.f32 %v6656_v32, %v7198_v26  ;;  %v7197_v13 = vand.u32 4294901760, %v6673_v43 }
 0x1bd   : > { %v1928_v8 = vand.u32 4294901760, %v1927_v39  ;;  %v1956_v19 = vand.u32 4294901760, %v1955_v29  ;;  %v1970_v58 = vand.u32 4294901760, %v1969_v48  ;;  %v7196_v39 = vand.u32 4294901760, %v6678_v61 }
 0x1be   : > { %5020 = vmatpush3.bf16.msra.mxu1 %v6527_v15  ;;  %v1977_v10 = vand.u32 4294901760, %v1976_v50  ;;  %v6690_v12 = vsub.f32 %v6571_v38, %v1837_v46  ;;  %v7194_v28 = vand.u32 4294901760, %v6695_v16  ;;  %v5073_v29 = vpack.c.bf16 %v6569_v42, %v6567_v9 }
 0x1bf   : > { %5022 = vmatprep.subr.bf16.mxu1 %v6531_v17  ;;  %v6630_v40 = vpack.c.bf16 %v1935_v24, %v1928_v8  ;;  %v6662_v57 = vpack.c.bf16 %v1963_v59, %v1956_v19  ;;  %v1983_v8 = vsub.f32 %v6673_v43, %v7197_v13  ;;  %v1990_v37 = vsub.f32 %v6678_v61, %v7196_v39 }
 0x1c0   : > { %v6682_v56 = vpack.c.bf16 %v1977_v10, %v1970_v58  ;;  %v7195_v24 = vand.u32 4294901760, %v6690_v12  ;;  %v2004_v46 = vsub.f32 %v6695_v16, %v7194_v28  ;;  %v5077_v25 = vpack.c.bf16 %v6595_v54, %v6593_v36 }
 0x1c1   : > { %v1984_v63 = vand.u32 4294901760, %v1983_v8  ;;  %v1991_v47 = vand.u32 4294901760, %v1990_v37  ;;  %v5081_v19 = vpack.c.bf16 %v6611_v55, %v6609_v11  ;;  %v5085_v59 = vpack.c.bf16 %v6626_v2, %v6624_v1  ;;  %v3343_v8 = vld [vmem:[#allocation4 + $0x2] ss:$0 sm:$0xff] }
 0x1c2   : > { %5024 = vmatpush3.bf16.msra.mxu1 %v6531_v17  ;;  %v1997_v38 = vsub.f32 %v6690_v12, %v7195_v24  ;;  %v2005_v22 = vand.u32 4294901760, %v2004_v46  ;;  %v5089_v48 = vpack.c.bf16 %v6639_v30, %v6636_v41  ;;  %v5093_v50 = vpack.c.bf16 %v6656_v32, %v6653_v62 }
 0x1c3   : > { %5026 = vmatprep.subr.bf16.mxu1 %v6541_v44  ;;  %v5065_v21 = vpack.c.bf16 %v1991_v47, %v1984_v63  ;;  %v6722_v58 = vpack.c.bf16 %v6678_v61, %v6673_v43  ;;  %v6726_v10 = vpack.c.bf16 %v6695_v16, %v6690_v12  ;;  %v5145_v9 = vpack.c.bf16 %v1933_v31, %v1926_v20 }
 0x1c4   : > { %v1998_v0 = vand.u32 4294901760, %v1997_v38  ;;  %v7261_v42 = vand.u32 4294901760, %v6626_v2  ;;  %v7263_v36 = vand.u32 4294901760, %v6639_v30  ;;  %v7266_v55 = vand.u32 4294901760, %v6673_v43  ;;  %v2501_v30 = vld [vmem:[#allocation10 + $0x20] sm:$0xff] }
 0x1c5   : > { %v7267_v20 = vand.u32 4294901760, %v6678_v61  ;;  %v7268_v1 = vand.u32 4294901760, %v6690_v12  ;;  %v7269_v2 = vand.u32 4294901760, %v6695_v16  ;;  %v6842_v43 = vld [vmem:[#allocation10 + $0x40] sm:$0xff]  ;;  %v6844_v61 = vld [vmem:[#allocation10 + $0x48] sm:$0xff] }
 0x1c6   : > { %5028 = vmatpush3.bf16.msra.mxu1 %v6541_v44  ;;  %v5069_v3 = vpack.c.bf16 %v2005_v22, %v1998_v0  ;;  %v2546_v12 = vand.u32 4294901760, %v6844_v61 }
 0x1c7   : > { %5030 = vmatprep.subr.bf16.mxu1 %v6551_v27  ;;  %v5161_v31 = vpack.c.bf16 %v7267_v20, %v7266_v55 }
 0x1ca   : > { %5032 = vmatpush3.bf16.msra.mxu1 %v6551_v27 }
 0x1cb   : > { %5034 = vmatprep.subr.bf16.mxu1 %v6565_v4 }
 0x1ce   : > { %5036 = vmatpush3.bf16.msra.mxu1 %v6565_v4 }
 0x1cf   : > { %5038 = vmatprep.subr.bf16.mxu1 %v6585_v53 }
 0x1d2   : > { %5040 = vmatpush3.bf16.msra.mxu1 %v6585_v53 }
 0x1d3   : > { %5042 = vmatprep.subr.bf16.mxu1 %v6601_v23 }
 0x24a   : > { %v3994_v37 = vpop.f32.mrb[0].mxu0 }
 0x24b   : > { %v5393_v63 = vadd.f32 %v3994_v37, %v3343_v8  ;;  %v1056_v47 = vpop.f32.mrb[1].mxu0 }
 0x24c   : > { %v5394_v38 = vadd.f32 %v3343_v8, %v1056_v47 }
 0x24d   : > { %v1069_v46 = vmin.f32 %v5393_v63, 0.0  ;;  %vm1067_vm0 = vcmp.gt.f32.partialorder %v5393_v63, 0.0 }
 0x24e   : > { %v1068_v0 = vmin.f32 %v5394_v38, 0.0  ;;  %vm1066_vm1 = vcmp.gt.f32.partialorder %v5394_v38, 0.0 }
 0x24f   : > { %v1072_v22 = vmul.f32 1.442695, %v1069_v46 }
 0x250   : > { %v1070_v28 = vmul.f32 1.442695, %v1068_v0  ;;  %v6880_v0 = vld [vmem:[#allocation10 + $0x70] sm:$0xff] }
 0x251   : > { %5531 = vpow2.f32 %v1072_v22  ;;  %v6882_v22 = vld [vmem:[#allocation10 + $0x78] sm:$0xff] }
 0x252   : > { %5533 = vpow2.f32 %v1070_v28 }
 0x25b   : > { %v5532_v24 = vpop.eup %5531 }
 0x25c   : > { %v5534_v39 = vpop.eup %5533  ;;  %v3345_v13 = vadd.f32 -1.0, %v5532_v24 }
 0x25d   : > { %v3344_v26 = vadd.f32 -1.0, %v5534_v39 }
 0x25e   : > { %v1077_v60 = vsel %vm1067_vm0, %v5393_v63, %v3345_v13 }
 0x25f   : > { %v6728_v5 = vand.u32 4294901760, %v1077_v60  ;;  %v1076_v6 = vsel %vm1066_vm1, %v5394_v38, %v3344_v26 }
 0x260   : > { %v6730_v33 = vand.u32 4294901760, %v1076_v6 }
 0x261   : > { %v6733_v8 = vsub.f32 %v1077_v60, %v6728_v5 }
 0x262   : > { %v1876_v37 = vsub.f32 %v1076_v6, %v6730_v33  ;;  %v2531_v6 = vand.u32 4294901760, %v2501_v30 }
 0x263   : > { %v1887_v47 = vand.u32 4294901760, %v6733_v8 }
 0x264   : > { %v1877_v28 = vand.u32 4294901760, %v1876_v37 }
 0x265   : > { %v1888_v24 = vsub.f32 %v6733_v8, %v1887_v47 }
 0x266   : > { %v1878_v39 = vsub.f32 %v1876_v37, %v1877_v28 }
 0x267   : > { %v1889_v63 = vand.u32 4294901760, %v1888_v24 }
 0x268   : > { %v1879_v13 = vand.u32 4294901760, %v1878_v39 }
 0x26a   : > { %4237 = vmatprep.mubr.f32.mxu1 %v1879_v13 }
 0x26b   : > { %4238 = vmatmul.mubr.f32.vlgmr.msra.gmra.mrb[0].mxu1 %v1889_v63 }
 0x26c   : > { %5044 = vmatpush3.bf16.msra.mxu1 %v6601_v23  ;;  %4272 = vmatprep.mubr.f32.mxu1 %v6730_v33  ;;  %v5137_v23 = vpack.c.bf16 %v1905_v49, %v1898_v52  ;;  %v5149_v52 = vpack.c.bf16 %v7261_v42, %v1940_v45  ;;  %v7262_v49 = vand.u32 4294901760, %v6636_v41  ;;  %v5165_v45 = vpack.c.bf16 %v7269_v2, %v7268_v1 }
 0x26d   : > { %5046 = vmatprep.subr.bf16.mxu1 %v6616_v34 }
 0x26e   : > { %v5153_v54 = vpack.c.bf16 %v7263_v36, %v7262_v49 }
 0x270   : > { %5048 = vmatpush3.bf16.msra.mxu1 %v6616_v34  ;;  %v5141_v34 = vpack.c.bf16 %v1919_v14, %v1912_v18  ;;  %v7264_v18 = vand.u32 4294901760, %v6653_v62  ;;  %v7265_v14 = vand.u32 4294901760, %v6656_v32  ;;  %v2503_v32 = vld [vmem:[#allocation10 + $0x30] sm:$0xff] }
 0x271   : > { %5050 = vmatprep.subr.bf16.mxu1 %v6630_v40  ;;  %v2537_v60 = vand.u32 4294901760, %v2503_v32 }
 0x272   : > { %v5157_v11 = vpack.c.bf16 %v7265_v14, %v7264_v18  ;;  %v6918_v18 = vsub.f32 %v2501_v30, %v2531_v6 }
 0x274   : > { %5052 = vmatpush3.bf16.msra.mxu1 %v6630_v40  ;;  %v2500_v40 = vld [vmem:[#allocation10 + $0x18] sm:$0xff]  ;;  %v2650_v20 = vand.u32 4294901760, %v6918_v18 }
 0x275   : > { %5054 = vmatprep.subr.bf16.mxu1 %v6658_v51  ;;  %v2528_v41 = vand.u32 4294901760, %v2500_v40 }
 0x276   : > { %v2651_v2 = vsub.f32 %v6918_v18, %v2650_v20 }
 0x278   : > { %5056 = vmatpush3.bf16.msra.mxu1 %v6658_v51  ;;  %v2504_v51 = vld [vmem:[#allocation10 + $0x38] sm:$0xff] }
 0x279   : > { %5058 = vmatprep.subr.bf16.mxu1 %v6662_v57  ;;  %v2540_v26 = vand.u32 4294901760, %v2504_v51 }
 0x27c   : > { %5060 = vmatpush3.bf16.msra.mxu1 %v6662_v57  ;;  %v6840_v57 = vpack.c.bf16 %v2540_v26, %v2537_v60 }
 0x27d   : > { %5062 = vmatprep.subr.bf16.mxu1 %v6682_v56 }
 0x280   : > { %5064 = vmatpush3.bf16.msra.mxu1 %v6682_v56  ;;  %v2543_v56 = vand.u32 4294901760, %v6842_v43 }
 0x281   : > { %5066 = vmatprep.subr.bf16.mxu1 %v5065_v21 }
 0x282   : > { %v6850_v16 = vpack.c.bf16 %v2546_v12, %v2543_v56  ;;  %v6945_v30 = vsub.f32 %v6842_v43, %v2543_v56 }
 0x284   : > { %5068 = vmatpush3.bf16.msra.mxu1 %v5065_v21  ;;  %v6852_v21 = vld [vmem:[#allocation10 + $0x50] sm:$0xff] }
 0x285   : > { %5070 = vmatprep.subr.bf16.mxu1 %v5069_v3 }
 0x288   : > { %5072 = vmatpush3.bf16.msra.mxu1 %v5069_v3  ;;  %v6854_v3 = vld [vmem:[#allocation10 + $0x58] sm:$0xff] }
 0x289   : > { %5074 = vmatprep.subr.bf16.mxu1 %v5073_v29 }
 0x28b   : > { %4273 = vmatmul.mubr.f32.vlgmr.msra.gmra.mrb[0].mxu1 %v6728_v5 }
 0x28c   : > { %5076 = vmatpush3.bf16.msra.mxu1 %v5073_v29  ;;  %4307 = vmatprep.mubr.f32.mxu1 %v1876_v37  ;;  %v2549_v29 = vand.u32 4294901760, %v6852_v21  ;;  %v2564_v37 = vand.u32 4294901760, %v6882_v22 }
 0x28d   : > { %5078 = vmatprep.subr.bf16.mxu1 %v5077_v25 }
 0x290   : > { %5080 = vmatpush3.bf16.msra.mxu1 %v5077_v25  ;;  %v2552_v25 = vand.u32 4294901760, %v6854_v3 }
 0x291   : > { %5082 = vmatprep.subr.bf16.mxu1 %v5081_v19 }
 0x292   : > { %v6965_v56 = vsub.f32 %v6854_v3, %v2552_v25 }
 0x294   : > { %5084 = vmatpush3.bf16.msra.mxu1 %v5081_v19  ;;  %v6860_v19 = vpack.c.bf16 %v2552_v25, %v2549_v29 }
 0x295   : > { %5086 = vmatprep.subr.bf16.mxu1 %v5085_v59 }
 0x298   : > { %5088 = vmatpush3.bf16.msra.mxu1 %v5085_v59  ;;  %v6862_v59 = vld [vmem:[#allocation10 + $0x60] sm:$0xff] }
 0x299   : > { %5090 = vmatprep.subr.bf16.mxu1 %v5089_v48 }
 0x29c   : > { %5092 = vmatpush3.bf16.msra.mxu1 %v5089_v48  ;;  %v6864_v48 = vld [vmem:[#allocation10 + $0x68] sm:$0xff] }
 0x29d   : > { %5094 = vmatprep.subr.bf16.mxu1 %v5093_v50 }
 0x2a0   : > { %5096 = vmatpush3.bf16.msra.mxu1 %v5093_v50  ;;  %v2555_v50 = vand.u32 4294901760, %v6862_v59 }
 0x2a1   : > { %5098 = vmatprep.subr.bf16.mxu1 %v6722_v58 }
 0x2a2   : > { %v6982_v3 = vsub.f32 %v6862_v59, %v2555_v50 }
 0x2a4   : > { %5100 = vmatpush3.bf16.msra.mxu1 %v6722_v58  ;;  %v2558_v58 = vand.u32 4294901760, %v6864_v48 }
 0x2a5   : > { %5102 = vmatprep.subr.bf16.mxu1 %v6726_v10 }
 0x2a8   : > { %5104 = vmatpush3.bf16.msra.mxu1 %v6726_v10  ;;  %v6874_v10 = vpack.c.bf16 %v2558_v58, %v2555_v50 }
 0x2a9   : > { %5106 = vmatprep.subr.bf16.mxu1 %v6519_v7 }
 0x2ab   : > { %4308 = vmatmul.mubr.f32.vlgmr.msra.gmra.mrb[0].mxu1 %v6733_v8  ;;  %v2561_v8 = vand.u32 4294901760, %v6880_v0 }
 0x2ac   : > { %5108 = vmatpush3.bf16.msra.mxu1 %v6519_v7  ;;  %4342 = vmatprep.mubr.f32.mxu1 %v1877_v28 }
 0x2ad   : > { %5110 = vmatprep.subr.bf16.mxu1 %v6523_v35  ;;  %v6894_v24 = vpack.c.bf16 %v2564_v37, %v2561_v8  ;;  %v6999_v59 = vsub.f32 %v6880_v0, %v2561_v8 }
 0x2b0   : > { %5112 = vmatpush3.bf16.msra.mxu1 %v6523_v35 }
 0x2b1   : > { %5114 = vmatprep.subr.bf16.mxu1 %v6527_v15 }
 0x2b4   : > { %5116 = vmatpush3.bf16.msra.mxu1 %v6527_v15 }
 0x2b5   : > { %5118 = vmatprep.subr.bf16.mxu1 %v6531_v17 }
 0x2b8   : > { %5120 = vmatpush3.bf16.msra.mxu1 %v6531_v17 }
 0x2b9   : > { %5122 = vmatprep.subr.bf16.mxu1 %v6541_v44 }
 0x2bc   : > { %5124 = vmatpush3.bf16.msra.mxu1 %v6541_v44 }
 0x2bd   : > { %5126 = vmatprep.subr.bf16.mxu1 %v6551_v27 }
 0x2c0   : > { %5128 = vmatpush3.bf16.msra.mxu1 %v6551_v27 }
 0x2c1   : > { %5130 = vmatprep.subr.bf16.mxu1 %v6565_v4 }
 0x2c4   : > { %5132 = vmatpush3.bf16.msra.mxu1 %v6565_v4 }
 0x2c5   : > { %5134 = vmatprep.subr.bf16.mxu1 %v6585_v53 }
 0x2c8   : > { %5136 = vmatpush3.bf16.msra.mxu1 %v6585_v53 }
 0x2c9   : > { %5138 = vmatprep.subr.bf16.mxu1 %v5137_v23 }
 0x2cb   : > { %4343 = vmatmul.mubr.f32.vlgmr.msra.gmra.mrb[0].mxu1 %v1887_v47 }
 0x2cc   : > { %5140 = vmatpush3.bf16.msra.mxu1 %v5137_v23  ;;  %4377 = vmatprep.mubr.f32.mxu1 %v6730_v33  ;;  %v6904_v23 = vsub.f32 %v2500_v40, %v2528_v41 }
 0x2cd   : > { %5142 = vmatprep.subr.bf16.mxu1 %v5141_v34 }
 0x2d0   : > { %5144 = vmatpush3.bf16.msra.mxu1 %v5141_v34 }
 0x2d1   : > { %5146 = vmatprep.subr.bf16.mxu1 %v5145_v9 }
 0x2d4   : > { %5148 = vmatpush3.bf16.msra.mxu1 %v5145_v9 }
 0x2d5   : > { %5150 = vmatprep.subr.bf16.mxu1 %v5149_v52 }
 0x2d8   : > { %5152 = vmatpush3.bf16.msra.mxu1 %v5149_v52  ;;  %v2643_v52 = vand.u32 4294901760, %v6904_v23 }
 0x2d9   : > { %5154 = vmatprep.subr.bf16.mxu1 %v5153_v54 }
 0x2dc   : > { %5156 = vmatpush3.bf16.msra.mxu1 %v5153_v54  ;;  %v2644_v54 = vsub.f32 %v6904_v23, %v2643_v52 }
 0x2dd   : > { %5158 = vmatprep.subr.bf16.mxu1 %v5157_v11 }
 0x2de   : > { %v2645_v55 = vand.u32 4294901760, %v2644_v54 }
 0x2e0   : > { %5160 = vmatpush3.bf16.msra.mxu1 %v5157_v11 }
 0x2e1   : > { %5162 = vmatprep.subr.bf16.mxu1 %v5161_v31 }
 0x2e4   : > { %5164 = vmatpush3.bf16.msra.mxu1 %v5161_v31 }
 0x2e5   : > { %5166 = vmatprep.subr.bf16.mxu1 %v5165_v45 }
 0x2e8   : > { %5168 = vmatpush3.bf16.msra.mxu1 %v5165_v45 }
 0x2e9   : > { %5170 = vmatprep.subr.bf16.mxu1 %v6519_v7 }
 0x2eb   : > { %4378 = vmatmul.mubr.f32.vlgmr.msra.gmra.mrb[0].mxu1 %v6728_v5 }
 0x2ec   : > { %5172 = vmatpush3.bf16.msra.mxu1 %v6519_v7  ;;  %4412 = vmatprep.mubr.f32.mxu1 %v6730_v33  ;;  %v2497_v7 = vld [vmem:[#allocation10] sm:$0xff] }
 0x2ed   : > { %5174 = vmatprep.subr.bf16.mxu1 %v6523_v35 }
 0x2f0   : > { %5176 = vmatpush3.bf16.msra.mxu1 %v6523_v35  ;;  %v2498_v35 = vld [vmem:[#allocation10 + $0x8] sm:$0xff] }
 0x2f1   : > { %5178 = vmatprep.subr.bf16.mxu1 %v6527_v15 }
 0x2f4   : > { %5180 = vmatpush3.bf16.msra.mxu1 %v6527_v15  ;;  %v2519_v15 = vand.u32 4294901760, %v2497_v7 }
 0x2f5   : > { %5182 = vmatprep.subr.bf16.mxu1 %v6531_v17 }
 0x2f6   : > { %v6876_v38 = vsub.f32 %v2497_v7, %v2519_v15  ;;  %v6933_v7 = vsub.f32 %v2503_v32, %v2537_v60  ;;  %v7210_v32 = vand.u32 4294901760, %v6945_v30 }
 0x2f8   : > { %5184 = vmatpush3.bf16.msra.mxu1 %v6531_v17  ;;  %v2522_v17 = vand.u32 4294901760, %v2498_v35  ;;  %v2622_v47 = vand.u32 4294901760, %v6876_v38 }
 0x2f9   : > { %5186 = vmatprep.subr.bf16.mxu1 %v6541_v44 }
 0x2fa   : > { %v6828_v33 = vpack.c.bf16 %v2522_v17, %v2519_v15  ;;  %v6878_v46 = vsub.f32 %v2498_v35, %v2522_v17  ;;  %v2623_v39 = vsub.f32 %v6876_v38, %v2622_v47  ;;  %v6935_v35 = vsub.f32 %v2504_v51, %v2540_v26 }
 0x2fb   : > { %v2652_v15 = vand.u32 4294901760, %v2651_v2  ;;  %v2679_v26 = vsub.f32 %v6945_v30, %v7210_v32 }
 0x2fc   : > { %5188 = vmatpush3.bf16.msra.mxu1 %v6541_v44  ;;  %v2499_v44 = vld [vmem:[#allocation10 + $0x10] sm:$0xff]  ;;  %5202 = vmatprep.subr.bf16.mxu0 %v6828_v33  ;;  %v2629_v28 = vand.u32 4294901760, %v6878_v46  ;;  %v2624_v34 = vand.u32 4294901760, %v2623_v39  ;;  %v7211_v40 = vand.u32 4294901760, %v6935_v35 }
 0x2fd   : > { %5190 = vmatprep.subr.bf16.mxu1 %v6551_v27  ;;  %5204 = vmatpush3.bf16.msra.mxu0 %v6828_v33  ;;  %v2680_v39 = vand.u32 4294901760, %v2679_v26  ;;  %v5265_v26 = vpack.c.bf16 %v6878_v46, %v6876_v38 }
 0x2fe   : > { %v2630_v13 = vsub.f32 %v6878_v46, %v2629_v28  ;;  %v7270_v46 = vand.u32 4294901760, %v6935_v35 }
 0x300   : > { %5192 = vmatpush3.bf16.msra.mxu1 %v6551_v27  ;;  %v2525_v27 = vand.u32 4294901760, %v2499_v44  ;;  %v2631_v9 = vand.u32 4294901760, %v2630_v13 }
 0x301   : > { %5194 = vmatprep.subr.bf16.mxu1 %v6565_v4 }
 0x302   : > { %v6902_v63 = vsub.f32 %v2499_v44, %v2525_v27  ;;  %v6910_v49 = vpack.c.bf16 %v2631_v9, %v2624_v34  ;;  %v2664_v44 = vand.u32 4294901760, %v6933_v7  ;;  %v7207_v9 = vand.u32 4294901760, %v6965_v56 }
 0x304   : > { %5196 = vmatpush3.bf16.msra.mxu1 %v6565_v4  ;;  %v6832_v4 = vpack.c.bf16 %v2528_v41, %v2525_v27  ;;  %v2636_v42 = vand.u32 4294901760, %v6902_v63  ;;  %v2665_v41 = vsub.f32 %v6933_v7, %v2664_v44 }
 0x305   : > { %5198 = vmatprep.subr.bf16.mxu1 %v6585_v53 }
 0x306   : > { %5206 = vmatprep.subr.bf16.mxu0 %v6832_v4  ;;  %v2637_v36 = vsub.f32 %v6902_v63, %v2636_v42 }
 0x307   : > { %5208 = vmatpush3.bf16.msra.mxu0 %v6832_v4 }
 0x308   : > { %5200 = vmatpush3.bf16.msra.mxu1 %v6585_v53  ;;  %v2502_v53 = vld [vmem:[#allocation10 + $0x28] sm:$0xff]  ;;  %v2638_v11 = vand.u32 4294901760, %v2637_v36 }
 0x30a   : > { %v6925_v1 = vpack.c.bf16 %v2645_v55, %v2638_v11  ;;  %v7206_v55 = vand.u32 4294901760, %v6982_v3 }
 0x30b   : > { %4413 = vmatmul.mubr.f32.vlgmr.msra.gmra.mrb[0].mxu1 %v6728_v5  ;;  %v2534_v5 = vand.u32 4294901760, %v2502_v53 }
 0x30d   : > { %v6836_v62 = vpack.c.bf16 %v2534_v5, %v2531_v6  ;;  %v6920_v14 = vsub.f32 %v2502_v53, %v2534_v5  ;;  %v6948_v53 = vsub.f32 %v6844_v61, %v2546_v12  ;;  %v2672_v6 = vsub.f32 %v6935_v35, %v7211_v40 }
 0x30e   : > { %v2666_v5 = vand.u32 4294901760, %v2665_v41  ;;  %v6962_v61 = vsub.f32 %v6852_v21, %v2549_v29  ;;  %v2700_v21 = vsub.f32 %v6965_v56, %v7207_v9  ;;  %v6987_v29 = vsub.f32 %v6864_v48, %v2558_v58 }
 0x30f   : > { %5210 = vmatprep.subr.bf16.mxu0 %v6836_v62  ;;  %v2657_v31 = vand.u32 4294901760, %v6920_v14  ;;  %v7209_v51 = vand.u32 4294901760, %v6948_v53  ;;  %v2673_v60 = vand.u32 4294901760, %v2672_v6  ;;  %v7004_v48 = vsub.f32 %v6882_v22, %v2564_v37 }
 0x310   : > { %5212 = vmatpush3.bf16.msra.mxu0 %v6836_v62  ;;  %v7208_v34 = vand.u32 4294901760, %v6962_v61  ;;  %v2701_v11 = vand.u32 4294901760, %v2700_v21  ;;  %v7205_v2 = vand.u32 4294901760, %v6987_v29  ;;  %v5285_v21 = vpack.c.bf16 %v6965_v56, %v6962_v61 }
 0x311   : > { %5214 = vmatprep.subr.bf16.mxu0 %v6840_v57  ;;  %v2658_v45 = vsub.f32 %v6920_v14, %v2657_v31  ;;  %v2686_v43 = vsub.f32 %v6948_v53, %v7209_v51  ;;  %v6967_v12 = vpack.c.bf16 %v2673_v60, %v2666_v5  ;;  %v7203_v41 = vand.u32 4294901760, %v7004_v48 }
 0x312   : > { %v2693_v54 = vsub.f32 %v6962_v61, %v7208_v34  ;;  %v2714_v50 = vsub.f32 %v6987_v29, %v7205_v2  ;;  %v5337_v38 = vpack.c.bf16 %v2657_v31, %v2650_v20  ;;  %v7276_v20 = vand.u32 4294901760, %v6987_v29 }
 0x313   : > { %v2659_v17 = vand.u32 4294901760, %v2658_v45  ;;  %v2687_v13 = vand.u32 4294901760, %v2686_v43  ;;  %v2728_v8 = vsub.f32 %v7004_v48, %v7203_v41  ;;  %v5269_v43 = vpack.c.bf16 %v6904_v23, %v6902_v63 }
 0x314   : > { %5216 = vmatpush3.bf16.msra.mxu0 %v6840_v57  ;;  %v2694_v25 = vand.u32 4294901760, %v2693_v54  ;;  %v2715_v6 = vand.u32 4294901760, %v2714_v50  ;;  %v5281_v54 = vpack.c.bf16 %v6948_v53, %v6945_v30  ;;  %v7272_v63 = vand.u32 4294901760, %v6948_v53 }
 0x315   : > { %5218 = vmatprep.subr.bf16.mxu0 %v6850_v16  ;;  %v6939_v27 = vpack.c.bf16 %v2659_v17, %v2652_v15  ;;  %v6971_v36 = vpack.c.bf16 %v2687_v13, %v2680_v39  ;;  %v2707_v15 = vsub.f32 %v6982_v3, %v7206_v55  ;;  %v7204_v17 = vand.u32 4294901760, %v6999_v59 }
 0x316   : > { %v6991_v45 = vpack.c.bf16 %v2701_v11, %v2694_v25  ;;  %v2729_v5 = vand.u32 4294901760, %v2728_v8  ;;  %v5273_v39 = vpack.c.bf16 %v6920_v14, %v6918_v18  ;;  %v5277_v13 = vpack.c.bf16 %v6935_v35, %v6933_v7 }
 0x317   : > { %v2708_v58 = vand.u32 4294901760, %v2707_v15  ;;  %v2721_v0 = vsub.f32 %v6999_v59, %v7204_v17  ;;  %v7031_v25 = vpack.c.bf16 %v6987_v29, %v6982_v3  ;;  %v7035_v11 = vpack.c.bf16 %v7004_v48, %v6999_v59  ;;  %v3346_v15 = vld [vmem:[#allocation4 + $0x3] ss:$0 sm:$0xff] }
 0x318   : > { %5220 = vmatpush3.bf16.msra.mxu0 %v6850_v16  ;;  %v7275_v14 = vand.u32 4294901760, %v6982_v3  ;;  %v7277_v7 = vand.u32 4294901760, %v6999_v59  ;;  %v7278_v35 = vand.u32 4294901760, %v7004_v48 }
 0x319   : > { %5222 = vmatprep.subr.bf16.mxu0 %v6860_v19  ;;  %v5257_v22 = vpack.c.bf16 %v2715_v6, %v2708_v58  ;;  %v2722_v37 = vand.u32 4294901760, %v2721_v0 }
 0x31a   : > { %v5353_v31 = vpack.c.bf16 %v7276_v20, %v7275_v14 }
 0x31b   : > { %v5261_v60 = vpack.c.bf16 %v2729_v5, %v2722_v37 }
 0x31c   : > { %5224 = vmatpush3.bf16.msra.mxu0 %v6860_v19 }
 0x31d   : > { %5226 = vmatprep.subr.bf16.mxu0 %v6874_v10 }
 0x320   : > { %5228 = vmatpush3.bf16.msra.mxu0 %v6874_v10 }
 0x321   : > { %5230 = vmatprep.subr.bf16.mxu0 %v6894_v24 }
 0x324   : > { %5232 = vmatpush3.bf16.msra.mxu0 %v6894_v24 }
 0x325   : > { %5234 = vmatprep.subr.bf16.mxu0 %v6910_v49 }
 0x3de   : > { %v4414_v50 = vpop.f32.mrb[0].mxu1 }
 0x3df   : > { %v2484_v58 = vadd.f32 %v4414_v50, %v3346_v15  ;;  %v2468_v6 = vpop.f32.mrb[1].mxu1 }
 0x3e0   : > { %v2483_v0 = vadd.f32 %v3346_v15, %v2468_v6 }
 0x3e1   : > { %v2488_v8 = vmin.f32 %v2484_v58, 0.0  ;;  %vm2486_vm2 = vcmp.gt.f32.partialorder %v2484_v58, 0.0 }
 0x3e2   : > { %v2487_v37 = vmin.f32 %v2483_v0, 0.0  ;;  %vm2485_vm3 = vcmp.gt.f32.partialorder %v2483_v0, 0.0 }
 0x3e3   : > { %v2491_v5 = vmul.f32 1.442695, %v2488_v8 }
 0x3e4   : > { %v2489_v41 = vmul.f32 1.442695, %v2487_v37 }
 0x3e5   : > { %5535 = vpow2.f32 %v2491_v5 }
 0x3e6   : > { %5537 = vpow2.f32 %v2489_v41 }
 0x3ef   : > { %v5536_v17 = vpop.eup %5535 }
 0x3f0   : > { %v5538_v2 = vpop.eup %5537  ;;  %v3348_v55 = vadd.f32 -1.0, %v5536_v17 }
 0x3f1   : > { %v3347_v9 = vadd.f32 -1.0, %v5538_v2 }
 0x3f2   : > { %v2496_v34 = vsel %vm2486_vm2, %v2484_v58, %v3348_v55 }
 0x3f3   : > { %v7037_v51 = vand.u32 4294901760, %v2496_v34  ;;  %v2495_v32 = vsel %vm2485_vm3, %v2483_v0, %v3347_v9 }
 0x3f4   : > { %v7039_v40 = vand.u32 4294901760, %v2495_v32 }
 0x3f5   : > { %v7042_v15 = vsub.f32 %v2496_v34, %v7037_v51 }
 0x3f6   : > { %v2600_v50 = vsub.f32 %v2495_v32, %v7039_v40 }
 0x3f7   : > { %v2611_v6 = vand.u32 4294901760, %v7042_v15 }
 0x3f8   : > { %v2601_v41 = vand.u32 4294901760, %v2600_v50 }
 0x3f9   : > { %v2612_v17 = vsub.f32 %v7042_v15, %v2611_v6 }
 0x3fa   : > { %v2602_v2 = vsub.f32 %v2600_v50, %v2601_v41 }
 0x3fb   : > { %v2613_v58 = vand.u32 4294901760, %v2612_v17 }
 0x3fc   : > { %v2603_v55 = vand.u32 4294901760, %v2602_v2 }
 0x3fe   : > { %4447 = vmatprep.mubr.f32.mxu0 %v2603_v55 }
 0x3ff   : > { %4448 = vmatmul.mubr.f32.vlgmr.msra.gmra.mrb[2].mxu0 %v2613_v58 }
 0x400   : > { %5236 = vmatpush3.bf16.msra.mxu0 %v6910_v49  ;;  %4482 = vmatprep.mubr.f32.mxu0 %v7039_v40  ;;  %v5329_v49 = vpack.c.bf16 %v2629_v28, %v2622_v47  ;;  %v5341_v47 = vpack.c.bf16 %v7270_v46, %v2664_v44  ;;  %v7271_v28 = vand.u32 4294901760, %v6945_v30  ;;  %v5357_v44 = vpack.c.bf16 %v7278_v35, %v7277_v7 }
 0x401   : > { %5238 = vmatprep.subr.bf16.mxu0 %v6925_v1 }
 0x402   : > { %v5345_v23 = vpack.c.bf16 %v7272_v63, %v7271_v28 }
 0x404   : > { %5240 = vmatpush3.bf16.msra.mxu0 %v6925_v1  ;;  %v5333_v1 = vpack.c.bf16 %v2643_v52, %v2636_v42  ;;  %v7273_v42 = vand.u32 4294901760, %v6962_v61  ;;  %v7274_v52 = vand.u32 4294901760, %v6965_v56 }
 0x405   : > { %5242 = vmatprep.subr.bf16.mxu0 %v6939_v27 }
 0x406   : > { %v5349_v18 = vpack.c.bf16 %v7274_v52, %v7273_v42 }
 0x408   : > { %5244 = vmatpush3.bf16.msra.mxu0 %v6939_v27 }
 0x409   : > { %5246 = vmatprep.subr.bf16.mxu0 %v6967_v12 }
 0x40c   : > { %5248 = vmatpush3.bf16.msra.mxu0 %v6967_v12 }
 0x40d   : > { %5250 = vmatprep.subr.bf16.mxu0 %v6971_v36 }
 0x410   : > { %5252 = vmatpush3.bf16.msra.mxu0 %v6971_v36 }
 0x411   : > { %5254 = vmatprep.subr.bf16.mxu0 %v6991_v45 }
 0x414   : > { %5256 = vmatpush3.bf16.msra.mxu0 %v6991_v45 }
 0x415   : > { %5258 = vmatprep.subr.bf16.mxu0 %v5257_v22 }
 0x418   : > { %5260 = vmatpush3.bf16.msra.mxu0 %v5257_v22 }
 0x419   : > { %5262 = vmatprep.subr.bf16.mxu0 %v5261_v60 }
 0x41c   : > { %5264 = vmatpush3.bf16.msra.mxu0 %v5261_v60 }
 0x41d   : > { %5266 = vmatprep.subr.bf16.mxu0 %v5265_v26 }
 0x41f   : > { %4483 = vmatmul.mubr.f32.vlgmr.msra.gmra.mrb[2].mxu0 %v7037_v51 }
 0x420   : > { %5268 = vmatpush3.bf16.msra.mxu0 %v5265_v26  ;;  %4517 = vmatprep.mubr.f32.mxu0 %v2600_v50 }
 0x421   : > { %5270 = vmatprep.subr.bf16.mxu0 %v5269_v43 }
 0x424   : > { %5272 = vmatpush3.bf16.msra.mxu0 %v5269_v43 }
 0x425   : > { %5274 = vmatprep.subr.bf16.mxu0 %v5273_v39 }
 0x428   : > { %5276 = vmatpush3.bf16.msra.mxu0 %v5273_v39 }
 0x429   : > { %5278 = vmatprep.subr.bf16.mxu0 %v5277_v13 }
 0x42c   : > { %5280 = vmatpush3.bf16.msra.mxu0 %v5277_v13 }
 0x42d   : > { %5282 = vmatprep.subr.bf16.mxu0 %v5281_v54 }
 0x430   : > { %5284 = vmatpush3.bf16.msra.mxu0 %v5281_v54 }
 0x431   : > { %5286 = vmatprep.subr.bf16.mxu0 %v5285_v21 }
 0x434   : > { %5288 = vmatpush3.bf16.msra.mxu0 %v5285_v21 }
 0x435   : > { %5290 = vmatprep.subr.bf16.mxu0 %v7031_v25 }
 0x438   : > { %5292 = vmatpush3.bf16.msra.mxu0 %v7031_v25 }
 0x439   : > { %5294 = vmatprep.subr.bf16.mxu0 %v7035_v11 }
 0x43c   : > { %5296 = vmatpush3.bf16.msra.mxu0 %v7035_v11 }
 0x43d   : > { %5298 = vmatprep.subr.bf16.mxu0 %v6828_v33 }
 0x43f   : > { %4518 = vmatmul.mubr.f32.vlgmr.msra.gmra.mrb[2].mxu0 %v7042_v15 }
 0x440   : > { %5300 = vmatpush3.bf16.msra.mxu0 %v6828_v33  ;;  %4552 = vmatprep.mubr.f32.mxu0 %v2601_v41 }
 0x441   : > { %5302 = vmatprep.subr.bf16.mxu0 %v6832_v4 }
 0x444   : > { %5304 = vmatpush3.bf16.msra.mxu0 %v6832_v4 }
 0x445   : > { %5306 = vmatprep.subr.bf16.mxu0 %v6836_v62 }
 0x448   : > { %5308 = vmatpush3.bf16.msra.mxu0 %v6836_v62 }
 0x449   : > { %5310 = vmatprep.subr.bf16.mxu0 %v6840_v57 }
 0x44c   : > { %5312 = vmatpush3.bf16.msra.mxu0 %v6840_v57 }
 0x44d   : > { %5314 = vmatprep.subr.bf16.mxu0 %v6850_v16 }
 0x450   : > { %5316 = vmatpush3.bf16.msra.mxu0 %v6850_v16 }
 0x451   : > { %5318 = vmatprep.subr.bf16.mxu0 %v6860_v19 }
 0x454   : > { %5320 = vmatpush3.bf16.msra.mxu0 %v6860_v19 }
 0x455   : > { %5322 = vmatprep.subr.bf16.mxu0 %v6874_v10 }
 0x458   : > { %5324 = vmatpush3.bf16.msra.mxu0 %v6874_v10 }
 0x459   : > { %5326 = vmatprep.subr.bf16.mxu0 %v6894_v24 }
 0x45c   : > { %5328 = vmatpush3.bf16.msra.mxu0 %v6894_v24 }
 0x45d   : > { %5330 = vmatprep.subr.bf16.mxu0 %v5329_v49 }
 0x45f   : > { %4553 = vmatmul.mubr.f32.vlgmr.msra.gmra.mrb[2].mxu0 %v2611_v6 }
 0x460   : > { %5332 = vmatpush3.bf16.msra.mxu0 %v5329_v49  ;;  %4587 = vmatprep.mubr.f32.mxu0 %v7039_v40 }
 0x461   : > { %5334 = vmatprep.subr.bf16.mxu0 %v5333_v1 }
 0x464   : > { %5336 = vmatpush3.bf16.msra.mxu0 %v5333_v1 }
 0x465   : > { %5338 = vmatprep.subr.bf16.mxu0 %v5337_v38 }
 0x468   : > { %5340 = vmatpush3.bf16.msra.mxu0 %v5337_v38 }
 0x469   : > { %5342 = vmatprep.subr.bf16.mxu0 %v5341_v47 }
 0x46c   : > { %5344 = vmatpush3.bf16.msra.mxu0 %v5341_v47 }
 0x46d   : > { %5346 = vmatprep.subr.bf16.mxu0 %v5345_v23 }
 0x470   : > { %5348 = vmatpush3.bf16.msra.mxu0 %v5345_v23 }
 0x471   : > { %5350 = vmatprep.subr.bf16.mxu0 %v5349_v18 }
 0x474   : > { %5352 = vmatpush3.bf16.msra.mxu0 %v5349_v18 }
 0x475   : > { %5354 = vmatprep.subr.bf16.mxu0 %v5353_v31 }
 0x478   : > { %5356 = vmatpush3.bf16.msra.mxu0 %v5353_v31 }
 0x479   : > { %5358 = vmatprep.subr.bf16.mxu0 %v5357_v44 }
 0x47c   : > { %5360 = vmatpush3.bf16.msra.mxu0 %v5357_v44 }
 0x47d   : > { %5362 = vmatprep.subr.bf16.mxu0 %v6828_v33 }
 0x47f   : > { %4588 = vmatmul.mubr.f32.vlgmr.msra.gmra.mrb[2].mxu0 %v7037_v51 }
 0x480   : > { %5364 = vmatpush3.bf16.msra.mxu0 %v6828_v33  ;;  %4622 = vmatprep.mubr.f32.mxu0 %v7039_v40  ;;  %v3349_v33 = vld [vmem:[#allocation4 + $0x4] ss:$0 sm:$0xff] }
 0x481   : > { %5366 = vmatprep.subr.bf16.mxu0 %v6832_v4 }
 0x484   : > { %5368 = vmatpush3.bf16.msra.mxu0 %v6832_v4 }
 0x485   : > { %5370 = vmatprep.subr.bf16.mxu0 %v6836_v62 }
 0x488   : > { %5372 = vmatpush3.bf16.msra.mxu0 %v6836_v62 }
 0x489   : > { %5374 = vmatprep.subr.bf16.mxu0 %v6840_v57 }
 0x48c   : > { %5376 = vmatpush3.bf16.msra.mxu0 %v6840_v57 }
 0x48d   : > { %5378 = vmatprep.subr.bf16.mxu0 %v6850_v16 }
 0x490   : > { %5380 = vmatpush3.bf16.msra.mxu0 %v6850_v16 }
 0x491   : > { %5382 = vmatprep.subr.bf16.mxu0 %v6860_v19 }
 0x494   : > { %5384 = vmatpush3.bf16.msra.mxu0 %v6860_v19 }
 0x495   : > { %5386 = vmatprep.subr.bf16.mxu0 %v6874_v10 }
 0x498   : > { %5388 = vmatpush3.bf16.msra.mxu0 %v6874_v10 }
 0x499   : > { %5390 = vmatprep.subr.bf16.mxu0 %v6894_v24 }
 0x49c   : > { %5392 = vmatpush3.bf16.msra.mxu0 %v6894_v24 }
 0x49f   : > { %4623 = vmatmul.mubr.f32.vlgmr.msra.gmra.mrb[2].mxu0 %v7037_v51 }
 0x572   : > { %v4624_v4 = vpop.f32.mrb[2].mxu0 }
 0x573   : > { %v3192_v62 = vpop.f32.mrb[3].mxu0  ;;  %v5395_v16 = vadd.f32 %v4624_v4, %v3349_v33 }
 0x574   : > { %v5396_v57 = vadd.f32 %v3349_v33, %v3192_v62 }
 0x575   : > { %3204 = vst.msk [vmem:[%s343_s25 + $0x8] sm:$0xff] %vm3202_vm4, %v5395_v16 }
 0x576   : > { %3203 = vst.msk [vmem:[%s343_s25] sm:$0xff] %vm3202_vm4, %v5396_v57 }
 0x577 PF: > { %p19_p5 = scmp.ge.s32.totalorder %s5964_s8, 4   ;;  %s7279_s21 = smov %s5747_s22 }
 0x578   : > { %s7280_s22 = smov %s5751_s23  ;;  %s7281_s23 = smov %s5975_s19 }
 0x579   : > { %s7282_s24 = smov %s5964_s8  ;;  %21 = sbr.rel (!%p19_p5) target bundleno = 6 (0x6), region = 104 }
 0x580   :  { %3227 = vsyncpa [#allocation3], 1 }
 0x581   :  { %3229 = vsyncpa [#allocation3 + $0x1], 1 }
 0x582   :  { %3230 = vsyncpa [#allocation5], 1 }
 0x583   :  { %3231 = vsyncpa [#allocation8], 1 }
 0x584   :  { %3232 = vsyncpa [#allocation11], 1 }

</bundles_post_ra>
